<compile_context>
chip_gen: v7x
topology: tpu7x:2x2x1
jax: 0.10.0
libtpu: 0.0.40
codegen_flags: <defaults>
</compile_context>

<pallas_src>
import functools

import jax
import jax.numpy as jnp
from jax.experimental import pallas as pl
from jax.experimental.pallas import tpu as pltpu


def _rup(a, b):
    return (a + b - 1) // b * b


# ConvTranspose2d(k=4, s=2, p=1) phase decomposition: output row y = 2m + py uses
# h1 rows m + di with kernel tap ky; same along width.
_PHASE_TAPS = (((1, 0), (3, -1)),   # phase 0 (even output index)
               ((0, 1), (2, 0)))    # phase 1 (odd output index)


def _vmem_caps():
    """Generation-aware VMEM numbers: (tile-picker working-set budget, Mosaic limit)."""
    cap = 64 << 20                                   # conservative (v7x-sized) fallback
    try:
        cap = int(getattr(pltpu.get_tpu_info(), "vmem_capacity_bytes", cap))
    except Exception:
        pass
    budget = min(48 << 20, (cap * 3) // 8)           # 48 MiB on v5e/v6e, 24 MiB on v7x
    limit = (cap * 3) // 4                           # 96 MiB on v5e/v6e, 48 MiB on v7x
    return budget, limit


def _tile_vmem_estimate(th, w, cin_p, cmid_p, cout_p, fold1, fold2):
    """Conservative per-grid-step VMEM working-set estimate (bytes)."""
    wp = w + 2
    lx, l1, lo = (th + 8) * wp, (th + 4) * wp, th * wp
    resident = (2 * cin_p * lx * 2            # double-buffered bf16 input block
                + 2 * 4 * cout_p * lo * 2     # double-buffered bf16 output block (4 phases)
                + cmid_p * l1 * 2             # bf16 h1 (live through the deconv stage)
                + l1 * 4)                     # f32 mask
    conv1 = (cmid_p * l1 * 4                                   # f32 conv1 accumulator
             + (9 if fold1 else 2) * cin_p * l1 * 2)           # K-stack / tap slices
    conv2 = (9 * cmid_p * lo * 2                               # hoisted h1 tap slices
             + (4 * cmid_p * lo * 2 if fold2 else cmid_p * lo * 2)
             + 2 * cout_p * lo * 4)                            # f32 acc (+ overlap slack)
    return resident + max(conv1, conv2)


def _pick_tile_rows(h, w, batch, cin_p, cmid_p, cout_p, fold1, fold2, budget):
    def est(th):
        return _tile_vmem_estimate(th, w, cin_p, cmid_p, cout_p, fold1, fold2)

    th = max(8, min(512, _rup(h, 8)))
    while th > 8 and est(th) > budget:
        th = max(8, _rup(th // 2, 8))

    def finalize(n_target):
        th2 = max(8, _rup(-(-h // n_target), 8))
        return th2, -(-h // th2)

    th, n = finalize(-(-h // th))
    # v7x megacore balance: prefer an even number of grid steps (2 TCs per chip).
    if (batch * n) % 2 == 1:
        th2, n2 = finalize(n + 1)
        if (batch * n2) % 2 == 0 and est(th2) <= budget:
            th, n = th2, n2
    return th, n


def make_params(key, in_channels, middle_channels, out_channels):
    """Torch-default-style uniform init.  w1: Conv2d (Cmid,Cin,3,3);
    wt: ConvTranspose2d (Cmid,Cout,4,4) (PyTorch layout)."""
    ks = jax.random.split(key, 4)

    def u(k, shape, fan_in):
        bound = 1.0 / (fan_in ** 0.5)
        return jax.random.uniform(k, shape, jnp.float32, -bound, bound)

    return dict(
        w1=u(ks[0], (middle_channels, in_channels, 3, 3), in_channels * 9),
        b1=u(ks[1], (middle_channels,), in_channels * 9),
        wt=u(ks[2], (middle_channels, out_channels, 4, 4), out_channels * 16),
        bt=u(ks[3], (out_channels,), out_channels * 16),
    )


@functools.partial(jax.jit, static_argnames=("tile_rows",))
def decoder_block_v2_forward(params, x, tile_rows=None):
    w1, b1, wt, bt = params["w1"], params["b1"], params["wt"], params["bt"]
    B, cin, H, W = x.shape
    cmid, cout = w1.shape[0], wt.shape[1]
    assert w1.shape == (cmid, cin, 3, 3) and wt.shape == (cmid, cout, 4, 4)

    # bf16 operands pack 16 rows per sublane tile -> pad bf16 channel dims to x16;
    # the f32 accumulator / output channel dim only needs x8.
    cin_p, cmid_p, cout_p = _rup(cin, 16), _rup(cmid, 16), _rup(cout, 8)
    Wp = W + 2

    # Fold conv taps into the MXU contraction dim when K stays inside one 256-wide
    # MXU pass; with big channel counts K=cin_p/cmid_p is already dense.
    fold1 = (9 * cin_p) <= 256
    fold2 = (4 * cmid_p) <= 256

    budget, vmem_limit = _vmem_caps()
    if tile_rows is None:
        TH, n_tiles = _pick_tile_rows(H, W, B, cin_p, cmid_p, cout_p,
                                      fold1, fold2, budget)
    else:
        TH = int(tile_rows)
        if TH < 8 or TH % 8 != 0:
            raise ValueError(f"tile_rows must be a positive multiple of 8, got {TH}")
        n_tiles = -(-H // TH)
    H_pad = n_tiles * TH
    est = _tile_vmem_estimate(TH, W, cin_p, cmid_p, cout_p, fold1, fold2)
    if est > vmem_limit:
        raise ValueError(
            f"row tile {TH} needs ~{est >> 20} MiB VMEM > limit {vmem_limit >> 20} MiB; "
            "use a smaller tile_rows")

    LX, L1, LO = (TH + 8) * Wp, (TH + 4) * Wp, TH * Wp

    # ---- pack weights: taps folded into the contraction dim, bf16 into the MXU ----
    w1p = jnp.zeros((cmid_p, cin_p, 3, 3), jnp.float32).at[:cmid, :cin].set(w1)
    W1f = (w1p.transpose(2, 3, 0, 1).reshape(9, cmid_p, cin_p)
              .transpose(1, 0, 2).reshape(cmid_p, 9 * cin_p).astype(jnp.bfloat16))
    B1 = jnp.zeros((cmid_p, 1), jnp.float32).at[:cmid, 0].set(b1)

    wtp = jnp.zeros((cmid_p, cout_p, 4, 4), jnp.float32).at[:cmid, :cout].set(wt)
    phase_rows = []
    for py in range(2):
        row = []
        for px in range(2):
            taps = [wtp[:, :, ky, kx].T                       # (cout_p, cmid_p)
                    for (ky, _d) in _PHASE_TAPS[py]
                    for (kx, _e) in _PHASE_TAPS[px]]
            row.append(jnp.concatenate(taps, axis=1))         # (cout_p, 4*cmid_p)
        phase_rows.append(jnp.stack(row, axis=0))
    WTf = jnp.stack(phase_rows, axis=0).astype(jnp.bfloat16)  # (2,2,cout_p,4*cmid_p)
    BT = jnp.zeros((cout_p, 1), jnp.float32).at[:cout, 0].set(bt)

    # ---- pre-tile the input with a 4-row halo; rows flattened with 1-col pads ----
    # (Halo duplication is only 8/TH of the input and keeps the slab on the automatic
    #  double-buffered BlockSpec pipeline.)
    xp = jnp.pad(x.astype(jnp.bfloat16),
                 ((0, 0), (0, cin_p - cin), (4, 4 + H_pad - H), (1, 1)))
    XT = jnp.stack([xp[:, :, t * TH: t * TH + TH + 8, :] for t in range(n_tiles)],
                   axis=1).reshape(B, n_tiles, cin_p, LX)

    # Static column-validity mask (zeroes the per-row pad cols 0 and W+1); loaded once
    # (constant block index).  The tile-dependent row mask is computed in-kernel.
    col_ok = ((jnp.arange(Wp) >= 1) & (jnp.arange(Wp) <= W)).astype(jnp.float32)
    COLMASK = jnp.tile(col_ok, TH + 4).reshape(1, L1)

    conv1_offs = tuple((ky + 1) * Wp + (kx - 1) for ky in range(3) for kx in range(3))

    def kernel(xt_ref, cmask_ref, w1_ref, b1_ref, wt_ref, bt_ref, out_ref):
        xin = xt_ref[0, 0]                                    # (cin_p, LX) bf16

        # ---- validity mask for the conv1 slab: rows [t*TH-2, t*TH+TH+2) of H ----
        t = pl.program_id(1)
        idx = jax.lax.broadcasted_iota(jnp.int32, (1, L1), 1)
        row_lo = jnp.maximum(2 - t * TH, 0) * Wp
        row_hi = jnp.minimum(H + 2 - t * TH, TH + 4) * Wp
        mask = cmask_ref[...] * ((idx >= row_lo) & (idx < row_hi)).astype(jnp.float32)

        # -------- Conv2d 3x3, pad=1 (+bias, ReLU) over TH+4 halo rows --------
        if fold1:
            xs = jnp.concatenate([xin[:, o:o + L1] for o in conv1_offs], axis=0)
            acc1 = jnp.dot(w1_ref[...], xs, preferred_element_type=jnp.float32)
        else:
            w1_all = w1_ref[...]
            acc1 = jnp.zeros((cmid_p, L1), jnp.float32)
            for k, o in enumerate(conv1_offs):
                acc1 = acc1 + jnp.dot(w1_all[:, k * cin_p:(k + 1) * cin_p],
                                      xin[:, o:o + L1],
                                      preferred_element_type=jnp.float32)
        h1 = (jnp.maximum(acc1 + b1_ref[...], 0.0) * mask).astype(jnp.bfloat16)

        # ---- the 9 unique shifted views of h1 shared by the 4 deconv phases ----
        h1s = {(di, dj): h1[:, (di + 2) * Wp + dj:(di + 2) * Wp + dj + LO]
               for di in (-1, 0, 1) for dj in (-1, 0, 1)}

        # ---- ConvTranspose2d 4x4, s=2, p=1 (+bias, ReLU): 4 sub-pixel phases ----
        for py in range(2):
            for px in range(2):
                taps = [(di, dj) for (_, di) in _PHASE_TAPS[py]
                        for (_, dj) in _PHASE_TAPS[px]]
                wt_pp = wt_ref[py, px]                        # (cout_p, 4*cmid_p)
                if fold2:
                    hs = jnp.concatenate([h1s[td] for td in taps], axis=0)
                    acc2 = jnp.dot(wt_pp, hs, preferred_element_type=jnp.float32)
                else:
                    acc2 = jnp.zeros((cout_p, LO), jnp.float32)
                    for i, td in enumerate(taps):
                        acc2 = acc2 + jnp.dot(
                            wt_pp[:, i * cmid_p:(i + 1) * cmid_p], h1s[td],
                            preferred_element_type=jnp.float32)
                out_ref[0, 0, py, px, :, :] = jnp.maximum(
                    acc2 + bt_ref[...], 0.0).astype(jnp.bfloat16)

    flops = 2 * B * n_tiles * (L1 * 9 * cin_p * cmid_p + LO * 16 * cmid_p * cout_p)
    out_elems = B * n_tiles * 4 * cout_p * LO
    bytes_accessed = (XT.size * 2 + COLMASK.size * 4 + W1f.size * 2 + WTf.size * 2
                      + B1.size * 4 + BT.size * 4 + out_elems * 2)

    out = pl.pallas_call(
        kernel,
        out_shape=jax.ShapeDtypeStruct((B, n_tiles, 2, 2, cout_p, LO), jnp.bfloat16),
        grid=(B, n_tiles),
        in_specs=[
            pl.BlockSpec((1, 1, cin_p, LX), lambda b, t: (b, t, 0, 0)),
            pl.BlockSpec((1, L1), lambda b, t: (0, 0)),
            pl.BlockSpec((cmid_p, 9 * cin_p), lambda b, t: (0, 0)),
            pl.BlockSpec((cmid_p, 1), lambda b, t: (0, 0)),
            pl.BlockSpec((2, 2, cout_p, 4 * cmid_p), lambda b, t: (0, 0, 0, 0)),
            pl.BlockSpec((cout_p, 1), lambda b, t: (0, 0)),
        ],
        out_specs=pl.BlockSpec((1, 1, 2, 2, cout_p, LO),
                               lambda b, t: (b, t, 0, 0, 0, 0)),
        compiler_params=pltpu.CompilerParams(
            dimension_semantics=("parallel", "parallel"),
            vmem_limit_bytes=int(vmem_limit)),
        cost_estimate=pl.CostEstimate(flops=flops, transcendentals=0,
                                      bytes_accessed=bytes_accessed),
    )(XT, COLMASK, W1f, B1, WTf, BT)

    # ---- interleave the 4 phases (pixel shuffle), strip pads, crop, cast to f32 ----
    out = out.reshape(B, n_tiles, 2, 2, cout_p, TH, Wp)
    out = out[:, :, :, :, :cout, :, 1:W + 1]                  # (B,t,py,px,Cout,TH,W)
    out = out.transpose(0, 4, 1, 5, 2, 6, 3)                  # (B,Cout,t,TH,py,W,px)
    out = out.reshape(B, cout, 2 * H_pad, 2 * W)
    return out[:, :, :2 * H, :].astype(jnp.float32)


def _reference_forward(params, x):
    """Pure-JAX reference of the same PyTorch forward (f32)."""
    w1, b1, wt, bt = params["w1"], params["b1"], params["wt"], params["bt"]
    h = jax.lax.conv_general_dilated(
        x, w1, window_strides=(1, 1), padding=((1, 1), (1, 1)),
        dimension_numbers=("NCHW", "OIHW", "NCHW"))
    h = jax.nn.relu(h + b1[None, :, None, None])
    # ConvTranspose2d(k=4,s=2,p=1) == conv of the 2x-dilated input, pad 2,
    # with the spatially flipped, (in,out)-swapped kernel.
    wtf = jnp.flip(wt, axis=(2, 3)).transpose(1, 0, 2, 3)
    y = jax.lax.conv_general_dilated(
        h, wtf, window_strides=(1, 1), padding=((2, 2), (2, 2)),
        lhs_dilation=(2, 2), dimension_numbers=("NCHW", "OIHW", "NCHW"))
    return jax.nn.relu(y + bt[None, :, None, None])


if __name__ == "__main__":
    key = jax.random.PRNGKey(0)

    # --- main config (small channels -> folded-tap MXU path) ---
    B, Cin, Cmid, Cout, H, W = 2, 12, 16, 6, 20, 18
    kx, kp, kx2, kp2 = jax.random.split(key, 4)
    x = jax.random.normal(kx, (B, Cin, H, W), jnp.float32)
    params = make_params(kp, Cin, Cmid, Cout)

    y = jax.block_until_ready(decoder_block_v2_forward(params, x))            # auto tile
    y_tiled = jax.block_until_ready(decoder_block_v2_forward(params, x, tile_rows=8))
    assert y.shape == (B, Cout, 2 * H, 2 * W), y.shape
    assert y_tiled.shape == y.shape

    y_ref = jax.block_until_ready(_reference_forward(params, x))
    err = float(jnp.max(jnp.abs(y - y_ref)))
    err_t = float(jnp.max(jnp.abs(y_tiled - y_ref)))
    assert err < 1e-1 and err_t < 1e-1, (err, err_t)   # bf16 in/out, f32 accumulation
    assert bool(jnp.all(jnp.isfinite(y)))

    # --- larger-channel config (exercises the per-tap fallback path) ---
    B2, Cin2, Cmid2, Cout2, H2, W2 = 1, 40, 72, 24, 10, 9
    x2 = jax.random.normal(kx2, (B2, Cin2, H2, W2), jnp.float32)
    params2 = make_params(kp2, Cin2, Cmid2, Cout2)
    y2 = jax.block_until_ready(decoder_block_v2_forward(params2, x2))
    y2_ref = jax.block_until_ready(_reference_forward(params2, x2))
    assert y2.shape == (B2, Cout2, 2 * H2, 2 * W2), y2.shape
    err2 = float(jnp.max(jnp.abs(y2 - y2_ref)))
    assert err2 < 1e-1, err2
    assert bool(jnp.all(jnp.isfinite(y2)))

    print("KERNEL_OK")
</pallas_src>

<mosaic_0001>
module attributes {stable_mosaic.version = 11 : i64} {
  func.func @kernel(%arg0: i32, %arg1: i32, %arg2: memref<1x1x16x640xbf16, #tpu.memory_space<vmem>>, %arg3: memref<1x560xf32, #tpu.memory_space<vmem>>, %arg4: memref<16x144xbf16, #tpu.memory_space<vmem>>, %arg5: memref<16x1xf32, #tpu.memory_space<vmem>>, %arg6: memref<2x2x8x64xbf16, #tpu.memory_space<vmem>>, %arg7: memref<8x1xf32, #tpu.memory_space<vmem>>, %arg8: memref<1x1x2x2x8x480xbf16, #tpu.memory_space<vmem>>) attributes {dimension_semantics = [#tpu.dimension_semantics<parallel>, #tpu.dimension_semantics<parallel>], iteration_bounds = array<i64: 2, 1>, scalar_prefetch = 0 : i64, scratch_operands = 0 : i64, tpu.core_type = #tpu.core_type<tc>, window_params = [{transform_indices = @transform_0, window_bounds = array<i64: 1, 1, 16, 640>}, {pipeline_mode = #tpu.pipeline_mode<synchronous>, transform_indices = @transform_1, window_bounds = array<i64: 1, 560>}, {pipeline_mode = #tpu.pipeline_mode<synchronous>, transform_indices = @transform_2, window_bounds = array<i64: 16, 144>}, {pipeline_mode = #tpu.pipeline_mode<synchronous>, transform_indices = @transform_3, window_bounds = array<i64: 16, 1>}, {pipeline_mode = #tpu.pipeline_mode<synchronous>, transform_indices = @transform_4, window_bounds = array<i64: 2, 2, 8, 64>}, {pipeline_mode = #tpu.pipeline_mode<synchronous>, transform_indices = @transform_5, window_bounds = array<i64: 8, 1>}, {transform_indices = @transform_6, window_bounds = array<i64: 1, 1, 2, 2, 8, 480>}]} {
    %c0 = arith.constant 0 : index
    %c0_0 = arith.constant 0 : index
    %c0_1 = arith.constant 0 : index
    %c0_2 = arith.constant 0 : index
    %0 = vector.load %arg2[%c0, %c0_0, %c0_1, %c0_2] : memref<1x1x16x640xbf16, #tpu.memory_space<vmem>>, vector<1x1x16x640xbf16>
    %1 = vector.shape_cast %0 : vector<1x1x16x640xbf16> to vector<16x640xbf16>
    %2 = tpu.iota {dimensions = array<i32: 1>} : vector<1x560xi32>
    %c24_i32 = arith.constant 24 : i32
    %3 = arith.muli %arg1, %c24_i32 : i32
    %c2_i32 = arith.constant 2 : i32
    %4 = arith.subi %c2_i32, %3 : i32
    %c0_i32 = arith.constant 0 : i32
    %5 = arith.maxsi %4, %c0_i32 : i32
    %c20_i32 = arith.constant 20 : i32
    %6 = arith.muli %5, %c20_i32 : i32
    %c24_i32_3 = arith.constant 24 : i32
    %7 = arith.muli %arg1, %c24_i32_3 : i32
    %c22_i32 = arith.constant 22 : i32
    %8 = arith.subi %c22_i32, %7 : i32
    %c28_i32 = arith.constant 28 : i32
    %9 = arith.minsi %8, %c28_i32 : i32
    %c20_i32_4 = arith.constant 20 : i32
    %10 = arith.muli %9, %c20_i32_4 : i32
    %c0_5 = arith.constant 0 : index
    %c0_6 = arith.constant 0 : index
    %11 = vector.load %arg3[%c0_5, %c0_6] : memref<1x560xf32, #tpu.memory_space<vmem>>, vector<1x560xf32>
    %12 = vector.broadcast %6 : i32 to vector<1x560xi32>
    %13 = arith.cmpi sge, %2, %12 : vector<1x560xi32>
    %14 = vector.broadcast %10 : i32 to vector<1x560xi32>
    %15 = arith.cmpi slt, %2, %14 : vector<1x560xi32>
    %16 = arith.andi %13, %15 : vector<1x560xi1>
    %17 = arith.extui %16 : vector<1x560xi1> to vector<1x560xi32>
    %18 = arith.sitofp %17 : vector<1x560xi32> to vector<1x560xf32>
    %19 = arith.mulf %11, %18 : vector<1x560xf32>
    %20 = vector.extract_strided_slice %1 {offsets = [0, 19], sizes = [16, 560], strides = [1, 1]} : vector<16x640xbf16> to vector<16x560xbf16>
    %21 = vector.extract_strided_slice %1 {offsets = [0, 20], sizes = [16, 560], strides = [1, 1]} : vector<16x640xbf16> to vector<16x560xbf16>
    %22 = vector.extract_strided_slice %1 {offsets = [0, 21], sizes = [16, 560], strides = [1, 1]} : vector<16x640xbf16> to vector<16x560xbf16>
    %23 = vector.extract_strided_slice %1 {offsets = [0, 39], sizes = [16, 560], strides = [1, 1]} : vector<16x640xbf16> to vector<16x560xbf16>
    %24 = vector.extract_strided_slice %1 {offsets = [0, 40], sizes = [16, 560], strides = [1, 1]} : vector<16x640xbf16> to vector<16x560xbf16>
    %25 = vector.extract_strided_slice %1 {offsets = [0, 41], sizes = [16, 560], strides = [1, 1]} : vector<16x640xbf16> to vector<16x560xbf16>
    %26 = vector.extract_strided_slice %1 {offsets = [0, 59], sizes = [16, 560], strides = [1, 1]} : vector<16x640xbf16> to vector<16x560xbf16>
    %27 = vector.extract_strided_slice %1 {offsets = [0, 60], sizes = [16, 560], strides = [1, 1]} : vector<16x640xbf16> to vector<16x560xbf16>
    %28 = vector.extract_strided_slice %1 {offsets = [0, 61], sizes = [16, 560], strides = [1, 1]} : vector<16x640xbf16> to vector<16x560xbf16>
    %29 = tpu.concatenate %20, %21, %22, %23, %24, %25, %26, %27, %28 in 0 : vector<16x560xbf16>, vector<16x560xbf16>, vector<16x560xbf16>, vector<16x560xbf16>, vector<16x560xbf16>, vector<16x560xbf16>, vector<16x560xbf16>, vector<16x560xbf16>, vector<16x560xbf16> -> vector<144x560xbf16>
    %c0_7 = arith.constant 0 : index
    %c0_8 = arith.constant 0 : index
    %30 = vector.load %arg4[%c0_7, %c0_8] : memref<16x144xbf16, #tpu.memory_space<vmem>>, vector<16x144xbf16>
    %cst = arith.constant dense<0.000000e+00> : vector<16x560xf32>
    %31 = tpu.matmul %30, %29, %cst {dimension_numbers = #tpu.dot_dimension_numbers<[1], [0], [0], [1], [0, 0, 1, 1], [], []>} : vector<16x144xbf16>, vector<144x560xbf16>, vector<16x560xf32> -> vector<16x560xf32>
    %c0_9 = arith.constant 0 : index
    %c0_10 = arith.constant 0 : index
    %32 = vector.load %arg5[%c0_9, %c0_10] : memref<16x1xf32, #tpu.memory_space<vmem>>, vector<16x1xf32>
    %33 = vector.broadcast %32 : vector<16x1xf32> to vector<16x560xf32>
    %34 = arith.addf %31, %33 : vector<16x560xf32>
    %cst_11 = arith.constant 0.000000e+00 : f32
    %35 = vector.broadcast %cst_11 : f32 to vector<16x560xf32>
    %36 = arith.maximumf %34, %35 : vector<16x560xf32>
    %37 = vector.broadcast %19 : vector<1x560xf32> to vector<16x560xf32>
    %38 = arith.mulf %36, %37 : vector<16x560xf32>
    %39 = arith.truncf %38 : vector<16x560xf32> to vector<16x560xbf16>
    %40 = vector.extract_strided_slice %39 {offsets = [0, 19], sizes = [16, 480], strides = [1, 1]} : vector<16x560xbf16> to vector<16x480xbf16>
    %41 = vector.extract_strided_slice %39 {offsets = [0, 20], sizes = [16, 480], strides = [1, 1]} : vector<16x560xbf16> to vector<16x480xbf16>
    %42 = vector.extract_strided_slice %39 {offsets = [0, 21], sizes = [16, 480], strides = [1, 1]} : vector<16x560xbf16> to vector<16x480xbf16>
    %43 = vector.extract_strided_slice %39 {offsets = [0, 39], sizes = [16, 480], strides = [1, 1]} : vector<16x560xbf16> to vector<16x480xbf16>
    %44 = vector.extract_strided_slice %39 {offsets = [0, 40], sizes = [16, 480], strides = [1, 1]} : vector<16x560xbf16> to vector<16x480xbf16>
    %45 = vector.extract_strided_slice %39 {offsets = [0, 41], sizes = [16, 480], strides = [1, 1]} : vector<16x560xbf16> to vector<16x480xbf16>
    %46 = vector.extract_strided_slice %39 {offsets = [0, 59], sizes = [16, 480], strides = [1, 1]} : vector<16x560xbf16> to vector<16x480xbf16>
    %47 = vector.extract_strided_slice %39 {offsets = [0, 60], sizes = [16, 480], strides = [1, 1]} : vector<16x560xbf16> to vector<16x480xbf16>
    %48 = vector.extract_strided_slice %39 {offsets = [0, 61], sizes = [16, 480], strides = [1, 1]} : vector<16x560xbf16> to vector<16x480xbf16>
    %c0_12 = arith.constant 0 : index
    %c0_13 = arith.constant 0 : index
    %c0_14 = arith.constant 0 : index
    %c0_15 = arith.constant 0 : index
    %49 = vector.load %arg6[%c0_12, %c0_13, %c0_14, %c0_15] : memref<2x2x8x64xbf16, #tpu.memory_space<vmem>>, vector<1x1x8x64xbf16>
    %50 = vector.shape_cast %49 : vector<1x1x8x64xbf16> to vector<8x64xbf16>
    %51 = tpu.concatenate %44, %43, %41, %40 in 0 : vector<16x480xbf16>, vector<16x480xbf16>, vector<16x480xbf16>, vector<16x480xbf16> -> vector<64x480xbf16>
    %cst_16 = arith.constant dense<0.000000e+00> : vector<8x480xf32>
    %52 = tpu.matmul %50, %51, %cst_16 {dimension_numbers = #tpu.dot_dimension_numbers<[1], [0], [0], [1], [0, 0, 1, 1], [], []>} : vector<8x64xbf16>, vector<64x480xbf16>, vector<8x480xf32> -> vector<8x480xf32>
    %c0_17 = arith.constant 0 : index
    %c0_18 = arith.constant 0 : index
    %53 = vector.load %arg7[%c0_17, %c0_18] : memref<8x1xf32, #tpu.memory_space<vmem>>, vector<8x1xf32>
    %54 = vector.broadcast %53 : vector<8x1xf32> to vector<8x480xf32>
    %55 = arith.addf %52, %54 : vector<8x480xf32>
    %cst_19 = arith.constant 0.000000e+00 : f32
    %56 = vector.broadcast %cst_19 : f32 to vector<8x480xf32>
    %57 = arith.maximumf %55, %56 : vector<8x480xf32>
    %58 = arith.truncf %57 : vector<8x480xf32> to vector<8x480xbf16>
    %c0_20 = arith.constant 0 : index
    %c0_21 = arith.constant 0 : index
    %c0_22 = arith.constant 0 : index
    %c0_23 = arith.constant 0 : index
    %c0_24 = arith.constant 0 : index
    %c0_25 = arith.constant 0 : index
    %59 = vector.load %arg8[%c0_20, %c0_21, %c0_22, %c0_23, %c0_24, %c0_25] : memref<1x1x2x2x8x480xbf16, #tpu.memory_space<vmem>>, vector<1x1x1x1x8x480xbf16>
    %60 = vector.shape_cast %59 : vector<1x1x1x1x8x480xbf16> to vector<8x480xbf16>
    %61 = vector.shape_cast %58 : vector<8x480xbf16> to vector<1x1x1x1x8x480xbf16>
    tpu.vector_store %arg8[%c0_20, %c0_21, %c0_22, %c0_23, %c0_24, %c0_25], %61 {strides = array<i32>} : memref<1x1x2x2x8x480xbf16, #tpu.memory_space<vmem>>, vector<1x1x1x1x8x480xbf16>,
    %c0_26 = arith.constant 0 : index
    %c1 = arith.constant 1 : index
    %c0_27 = arith.constant 0 : index
    %c0_28 = arith.constant 0 : index
    %62 = vector.load %arg6[%c0_26, %c1, %c0_27, %c0_28] : memref<2x2x8x64xbf16, #tpu.memory_space<vmem>>, vector<1x1x8x64xbf16>
    %63 = vector.shape_cast %62 : vector<1x1x8x64xbf16> to vector<8x64xbf16>
    %64 = tpu.concatenate %45, %44, %42, %41 in 0 : vector<16x480xbf16>, vector<16x480xbf16>, vector<16x480xbf16>, vector<16x480xbf16> -> vector<64x480xbf16>
    %cst_29 = arith.constant dense<0.000000e+00> : vector<8x480xf32>
    %65 = tpu.matmul %63, %64, %cst_29 {dimension_numbers = #tpu.dot_dimension_numbers<[1], [0], [0], [1], [0, 0, 1, 1], [], []>} : vector<8x64xbf16>, vector<64x480xbf16>, vector<8x480xf32> -> vector<8x480xf32>
    %c0_30 = arith.constant 0 : index
    %c0_31 = arith.constant 0 : index
    %66 = vector.load %arg7[%c0_30, %c0_31] : memref<8x1xf32, #tpu.memory_space<vmem>>, vector<8x1xf32>
    %67 = vector.broadcast %66 : vector<8x1xf32> to vector<8x480xf32>
    %68 = arith.addf %65, %67 : vector<8x480xf32>
    %cst_32 = arith.constant 0.000000e+00 : f32
    %69 = vector.broadcast %cst_32 : f32 to vector<8x480xf32>
    %70 = arith.maximumf %68, %69 : vector<8x480xf32>
    %71 = arith.truncf %70 : vector<8x480xf32> to vector<8x480xbf16>
    %c0_33 = arith.constant 0 : index
    %c0_34 = arith.constant 0 : index
    %c0_35 = arith.constant 0 : index
    %c1_36 = arith.constant 1 : index
    %c0_37 = arith.constant 0 : index
    %c0_38 = arith.constant 0 : index
    %72 = vector.load %arg8[%c0_33, %c0_34, %c0_35, %c1_36, %c0_37, %c0_38] : memref<1x1x2x2x8x480xbf16, #tpu.memory_space<vmem>>, vector<1x1x1x1x8x480xbf16>
    %73 = vector.shape_cast %72 : vector<1x1x1x1x8x480xbf16> to vector<8x480xbf16>
    %74 = vector.shape_cast %71 : vector<8x480xbf16> to vector<1x1x1x1x8x480xbf16>
    tpu.vector_store %arg8[%c0_33, %c0_34, %c0_35, %c1_36, %c0_37, %c0_38], %74 {strides = array<i32>} : memref<1x1x2x2x8x480xbf16, #tpu.memory_space<vmem>>, vector<1x1x1x1x8x480xbf16>,
    %c1_39 = arith.constant 1 : index
    %c0_40 = arith.constant 0 : index
    %c0_41 = arith.constant 0 : index
    %c0_42 = arith.constant 0 : index
    %75 = vector.load %arg6[%c1_39, %c0_40, %c0_41, %c0_42] : memref<2x2x8x64xbf16, #tpu.memory_space<vmem>>, vector<1x1x8x64xbf16>
    %76 = vector.shape_cast %75 : vector<1x1x8x64xbf16> to vector<8x64xbf16>
    %77 = tpu.concatenate %47, %46, %44, %43 in 0 : vector<16x480xbf16>, vector<16x480xbf16>, vector<16x480xbf16>, vector<16x480xbf16> -> vector<64x480xbf16>
    %cst_43 = arith.constant dense<0.000000e+00> : vector<8x480xf32>
    %78 = tpu.matmul %76, %77, %cst_43 {dimension_numbers = #tpu.dot_dimension_numbers<[1], [0], [0], [1], [0, 0, 1, 1], [], []>} : vector<8x64xbf16>, vector<64x480xbf16>, vector<8x480xf32> -> vector<8x480xf32>
    %c0_44 = arith.constant 0 : index
    %c0_45 = arith.constant 0 : index
    %79 = vector.load %arg7[%c0_44, %c0_45] : memref<8x1xf32, #tpu.memory_space<vmem>>, vector<8x1xf32>
    %80 = vector.broadcast %79 : vector<8x1xf32> to vector<8x480xf32>
    %81 = arith.addf %78, %80 : vector<8x480xf32>
    %cst_46 = arith.constant 0.000000e+00 : f32
    %82 = vector.broadcast %cst_46 : f32 to vector<8x480xf32>
    %83 = arith.maximumf %81, %82 : vector<8x480xf32>
    %84 = arith.truncf %83 : vector<8x480xf32> to vector<8x480xbf16>
    %c0_47 = arith.constant 0 : index
    %c0_48 = arith.constant 0 : index
    %c1_49 = arith.constant 1 : index
    %c0_50 = arith.constant 0 : index
    %c0_51 = arith.constant 0 : index
    %c0_52 = arith.constant 0 : index
    %85 = vector.load %arg8[%c0_47, %c0_48, %c1_49, %c0_50, %c0_51, %c0_52] : memref<1x1x2x2x8x480xbf16, #tpu.memory_space<vmem>>, vector<1x1x1x1x8x480xbf16>
    %86 = vector.shape_cast %85 : vector<1x1x1x1x8x480xbf16> to vector<8x480xbf16>
    %87 = vector.shape_cast %84 : vector<8x480xbf16> to vector<1x1x1x1x8x480xbf16>
    tpu.vector_store %arg8[%c0_47, %c0_48, %c1_49, %c0_50, %c0_51, %c0_52], %87 {strides = array<i32>} : memref<1x1x2x2x8x480xbf16, #tpu.memory_space<vmem>>, vector<1x1x1x1x8x480xbf16>,
    %c1_53 = arith.constant 1 : index
    %c1_54 = arith.constant 1 : index
    %c0_55 = arith.constant 0 : index
    %c0_56 = arith.constant 0 : index
    %88 = vector.load %arg6[%c1_53, %c1_54, %c0_55, %c0_56] : memref<2x2x8x64xbf16, #tpu.memory_space<vmem>>, vector<1x1x8x64xbf16>
    %89 = vector.shape_cast %88 : vector<1x1x8x64xbf16> to vector<8x64xbf16>
    %90 = tpu.concatenate %48, %47, %45, %44 in 0 : vector<16x480xbf16>, vector<16x480xbf16>, vector<16x480xbf16>, vector<16x480xbf16> -> vector<64x480xbf16>
    %cst_57 = arith.constant dense<0.000000e+00> : vector<8x480xf32>
    %91 = tpu.matmul %89, %90, %cst_57 {dimension_numbers = #tpu.dot_dimension_numbers<[1], [0], [0], [1], [0, 0, 1, 1], [], []>} : vector<8x64xbf16>, vector<64x480xbf16>, vector<8x480xf32> -> vector<8x480xf32>
    %c0_58 = arith.constant 0 : index
    %c0_59 = arith.constant 0 : index
    %92 = vector.load %arg7[%c0_58, %c0_59] : memref<8x1xf32, #tpu.memory_space<vmem>>, vector<8x1xf32>
    %93 = vector.broadcast %92 : vector<8x1xf32> to vector<8x480xf32>
    %94 = arith.addf %91, %93 : vector<8x480xf32>
    %cst_60 = arith.constant 0.000000e+00 : f32
    %95 = vector.broadcast %cst_60 : f32 to vector<8x480xf32>
    %96 = arith.maximumf %94, %95 : vector<8x480xf32>
    %97 = arith.truncf %96 : vector<8x480xf32> to vector<8x480xbf16>
    %c0_61 = arith.constant 0 : index
    %c0_62 = arith.constant 0 : index
    %c1_63 = arith.constant 1 : index
    %c1_64 = arith.constant 1 : index
    %c0_65 = arith.constant 0 : index
    %c0_66 = arith.constant 0 : index
    %98 = vector.load %arg8[%c0_61, %c0_62, %c1_63, %c1_64, %c0_65, %c0_66] : memref<1x1x2x2x8x480xbf16, #tpu.memory_space<vmem>>, vector<1x1x1x1x8x480xbf16>
    %99 = vector.shape_cast %98 : vector<1x1x1x1x8x480xbf16> to vector<8x480xbf16>
    %100 = vector.shape_cast %97 : vector<8x480xbf16> to vector<1x1x1x1x8x480xbf16>
    tpu.vector_store %arg8[%c0_61, %c0_62, %c1_63, %c1_64, %c0_65, %c0_66], %100 {strides = array<i32>} : memref<1x1x2x2x8x480xbf16, #tpu.memory_space<vmem>>, vector<1x1x1x1x8x480xbf16>,
    return
  }
  func.func @transform_0(%arg0: i32, %arg1: i32) -> (i32, i32, i32, i32) {
    %c0_i32 = arith.constant 0 : i32
    %c0_i32_0 = arith.constant 0 : i32
    %c0_i32_1 = arith.constant 0 : i32
    return %arg0, %arg1, %c0_i32, %c0_i32_0 : i32, i32, i32, i32
  }
  func.func @transform_1(%arg0: i32, %arg1: i32) -> (i32, i32) {
    %c0_i32 = arith.constant 0 : i32
    %c0_i32_0 = arith.constant 0 : i32
    %c0_i32_1 = arith.constant 0 : i32
    return %c0_i32, %c0_i32_0 : i32, i32
  }
  func.func @transform_2(%arg0: i32, %arg1: i32) -> (i32, i32) {
    %c0_i32 = arith.constant 0 : i32
    %c0_i32_0 = arith.constant 0 : i32
    %c0_i32_1 = arith.constant 0 : i32
    return %c0_i32, %c0_i32_0 : i32, i32
  }
  func.func @transform_3(%arg0: i32, %arg1: i32) -> (i32, i32) {
    %c0_i32 = arith.constant 0 : i32
    %c0_i32_0 = arith.constant 0 : i32
    %c0_i32_1 = arith.constant 0 : i32
    return %c0_i32, %c0_i32_0 : i32, i32
  }
  func.func @transform_4(%arg0: i32, %arg1: i32) -> (i32, i32, i32, i32) {
    %c0_i32 = arith.constant 0 : i32
    %c0_i32_0 = arith.constant 0 : i32
    %c0_i32_1 = arith.constant 0 : i32
    %c0_i32_2 = arith.constant 0 : i32
    %c0_i32_3 = arith.constant 0 : i32
    return %c0_i32, %c0_i32_0, %c0_i32_1, %c0_i32_2 : i32, i32, i32, i32
  }
  func.func @transform_5(%arg0: i32, %arg1: i32) -> (i32, i32) {
    %c0_i32 = arith.constant 0 : i32
    %c0_i32_0 = arith.constant 0 : i32
    %c0_i32_1 = arith.constant 0 : i32
    return %c0_i32, %c0_i32_0 : i32, i32
  }
  func.func @transform_6(%arg0: i32, %arg1: i32) -> (i32, i32, i32, i32, i32, i32) {
    %c0_i32 = arith.constant 0 : i32
    %c0_i32_0 = arith.constant 0 : i32
    %c0_i32_1 = arith.constant 0 : i32
    %c0_i32_2 = arith.constant 0 : i32
    %c0_i32_3 = arith.constant 0 : i32
    return %arg0, %arg1, %c0_i32, %c0_i32_0, %c0_i32_1, %c0_i32_2 : i32, i32, i32, i32, i32, i32
  }
}

</mosaic_0001>

<bundles_post_ra>
// kernel: tile.8
= control target key start
LH: loop header
LB: loop body
LE: loop exit
PB: predicated region body
PF: predicated region fallthrough
CT: control target
= control target key end

     0   :  { %s40_s0 = inlined_call_operand.vmem [shape: f32[20], index: 0, kind: input, shape index: {}]   ;;  %s41_s1 = inlined_call_operand.vmem [shape: f32[28,20], index: 1, kind: output, shape index: {}]  }
   0x1   :  { %v4_v0 = vld [vmem:[%s40_s0] ss:$0 sm:$0xff] }
   0x2   :  { %5 = vst [vmem:[%s41_s1] sm:$0xff] %v4_v0  ;;  %12 = vst [vmem:[%s41_s1 + $0x8] sm:$0xff] %v4_v0 }
   0x3   :  { %13 = vst [vmem:[%s41_s1 + $0x10] sm:$0xff] %v4_v0  ;;  %14 = vst [vmem:[%s41_s1 + $0x18] sm:$0xff] %v4_v0 }

// kernel: tile.9
= control target key start
LH: loop header
LB: loop body
LE: loop exit
PB: predicated region body
PF: predicated region fallthrough
CT: control target
= control target key end

     0   :  { %vm9_vm0 = vcmask 31744   ;;  %vm13_vm1 = vcmask 130048   ;;  %s310_s14 = smov 124   ;;  %vm23_vm2 = vcmask 64512   ;;  %s311_s19 = smov 112   ;;  %vm27_vm3 = vcmask 97280   ;;  %s466_s0 = inlined_call_operand.vmem [shape: f32[28,20], index: 0, kind: input, shape index: {}]   ;;  %s467_s1 = inlined_call_operand.vmem [shape: f32[1,560], index: 1, kind: output, shape index: {}]  }
   0x1   :  { %v248_v0 = vld [vmem:[%s466_s0 + $0x13] sm:$0x1]   ;;  %v254_v3 = vld [vmem:[%s466_s0 + $0xc] sm:$0x1]   ;;  %v250_v6 = vld [vmem:[%s466_s0 + $0x6] sm:$0x1]  }
   0x2   :  { %v249_v1 = vld [vmem:[%s466_s0 + $0x13] sm:$0x1]   ;;  %v255_v4 = vld [vmem:[%s466_s0 + $0xc] sm:$0x1]   ;;  %v251_v7 = vld [vmem:[%s466_s0 + $0x6] sm:$0x1]  }
   0x3   :  { %v10_v2 = vsel %vm9_vm0, %v249_v1, %v248_v0  ;;  %v51_v5 = vsel %vm13_vm1, %v255_v4, %v254_v3  ;;  %v24_v8 = vsel %vm23_vm2, %v251_v7, %v250_v6  ;;  %v252_v9 = vld [vmem:[%s466_s0 + $0x19] sm:$0x1]   ;;  %s312_s24 = smov 120   ;;  %s313_s25 = smov 116   ;;  %v256_v12 = vld [vmem:[%s466_s0 + $0x12] sm:$0x1]  }
   0x4   :  { %11 = vrot.lane.b32.xlu0 %v10_v2, %s310_s14  ;;  %52 = vrot.lane.b32.xlu1 %v51_v5, %s311_s19  ;;  %v253_v10 = vld [vmem:[%s466_s0 + $0x19] sm:$0x1]   ;;  %v257_v13 = vld [vmem:[%s466_s0 + $0x5] sm:$0x1]   ;;  %s314_s30 = smov 104   ;;  %s315_s2 = smov 100  }
   0x5   :  { %v37_v11 = vsel %vm27_vm3, %v253_v10, %v252_v9  ;;  %v258_v14 = vld [vmem:[%s466_s0 + $0x18] sm:$0x1]   ;;  %v259_v15 = vld [vmem:[%s466_s0 + $0xb] sm:$0x1]   ;;  %s316_s7 = smov 96   ;;  %s317_s8 = smov 92  }
   0x6   :  { %v260_v16 = vld [vmem:[%s466_s0 + $0x11] sm:$0x1]   ;;  %v261_v17 = vld [vmem:[%s466_s0 + $0x4] sm:$0x1]   ;;  %v2_v18 = vld [vmem:[%s466_s0] sm:$0x1]  }
   0x7   :  { %vm3_vm4 = vcmask 162816   ;;  %s318_s15 = smov 84   ;;  %s319_s16 = smov 80   ;;  %v262_v19 = vld [vmem:[%s466_s0 + $0x17] sm:$0x1]   ;;  %vm16_vm5 = vcmask 1048544  }
   0x8   :  { %25 = vrot.lane.b32.xlu0 %v24_v8, %s312_s24  ;;  %38 = vrot.lane.b32.xlu1 %v37_v11, %s313_s25  ;;  %4 = vst.msk [vmem:[#allocation0] sm:$0x1] %vm3_vm4, %v2_v18   ;;  %v263_v20 = vld [vmem:[%s466_s0 + $0xa] sm:$0x1]   ;;  %s320_s21 = smov 76   ;;  %s321_s22 = smov 72  }
   0x9   :  { %v264_v21 = vld [vmem:[%s466_s0 + $0x10] sm:$0x1]   ;;  %v265_v22 = vld [vmem:[%s466_s0 + $0x3] sm:$0x1]   ;;  %s322_s27 = smov 64   ;;  %s323_s28 = smov 60  }
   0xa   :  { %v266_v23 = vld [vmem:[%s466_s0 + $0x16] sm:$0x1]   ;;  %v267_v24 = vld [vmem:[%s466_s0 + $0x9] sm:$0x1]   ;;  %s324_s4 = smov 56   ;;  %s325_s5 = smov 52  }
   0xb   :  { %v268_v25 = vld [vmem:[%s466_s0 + $0xf] sm:$0x1]   ;;  %v269_v26 = vld [vmem:[%s466_s0 + $0x2] sm:$0x1]   ;;  %s326_s10 = smov 44   ;;  %s327_s11 = smov 40  }
   0xc   :  { %62 = vrot.lane.b32.xlu0 %v256_v12, %s314_s30  ;;  %69 = vrot.lane.b32.xlu1 %v257_v13, %s315_s2  ;;  %v270_v27 = vld [vmem:[%s466_s0 + $0x15] sm:$0x1]   ;;  %v271_v28 = vld [vmem:[%s466_s0 + $0x8] sm:$0x1]   ;;  %s329_s17 = smov 32   ;;  %s331_s23 = smov 24  }
   0xd   :  { %v272_v29 = vld [vmem:[%s466_s0 + $0x1b] sm:$0x1]   ;;  %v273_v30 = vld [vmem:[%s466_s0 + $0xe] sm:$0x1]   ;;  %v274_v31 = vld [vmem:[%s466_s0 + $0x1] sm:$0x1]  }
   0xe   :  { %v275_v32 = vld [vmem:[%s466_s0 + $0x14] sm:$0x1]   ;;  %s333_s29 = smov 16   ;;  %v276_v33 = vld [vmem:[%s466_s0 + $0x7] sm:$0x1]   ;;  %s335_s6 = smov 8  }
   0xf   :  { %v277_v34 = vld [vmem:[%s466_s0 + $0x1a] sm:$0x1]   ;;  %v278_v35 = vld [vmem:[%s466_s0 + $0xd] sm:$0x1]   ;;  %s336_s0 = smov 4   ;;  %vm30_vm6 = vcmask 1048512  }
  0x10   :  { %75 = vrot.lane.b32.xlu0 %v258_v14, %s316_s7  ;;  %82 = vrot.lane.b32.xlu1 %v259_v15, %s317_s8  ;;  %vm57_vm7 = vcmask 1048448   ;;  %vm43_vm8 = vcmask 1048480   ;;  %vm64_vm9 = vcmask 1015616   ;;  %vm71_vm10 = vcmask 982816  }
  0x11   :  { %vm77_vm11 = vcmask 950016   ;;  %vm84_vm12 = vcmask 917216   ;;  %vm91_vm13 = vcmask 851616   ;;  %vm98_vm14 = vcmask 818816  }
  0x12   :  { %vm104_vm15 = vcmask 786016   ;;  %vm138_vm4 = vcmask 589216  }
  0x14   :  { %89 = vrot.lane.b32.xlu0 %v260_v16, %s318_s15  ;;  %96 = vrot.lane.b32.xlu1 %v261_v17, %s319_s16  ;;  %s328_s16 = smov 36  }
  0x18   :  { %102 = vrot.lane.b32.xlu0 %v262_v19, %s320_s21  ;;  %109 = vrot.lane.b32.xlu1 %v263_v20, %s321_s22  ;;  %s330_s22 = smov 28  }
  0x1c   :  { %116 = vrot.lane.b32.xlu0 %v264_v21, %s322_s27  ;;  %123 = vrot.lane.b32.xlu1 %v265_v22, %s323_s28  ;;  %s332_s28 = smov 20  }
  0x20   :  { %129 = vrot.lane.b32.xlu0 %v266_v23, %s324_s4  ;;  %136 = vrot.lane.b32.xlu1 %v267_v24, %s325_s5  ;;  %s334_s5 = smov 12  }
  0x24   :  { %143 = vrot.lane.b32.xlu0 %v268_v25, %s326_s10  ;;  %150 = vrot.lane.b32.xlu1 %v269_v26, %s327_s11 }
  0x28   :  { %156 = vrot.lane.b32.xlu0 %v270_v27, %s328_s16  ;;  %163 = vrot.lane.b32.xlu1 %v271_v28, %s329_s17 }
  0x2c   :  { %170 = vrot.lane.b32.xlu0 %v272_v29, %s330_s22  ;;  %177 = vrot.lane.b32.xlu1 %v273_v30, %s331_s23 }
  0x30   :  { %184 = vrot.lane.b32.xlu0 %v274_v31, %s332_s28  ;;  %190 = vrot.lane.b32.xlu1 %v275_v32, %s333_s29 }
  0x34   :  { %197 = vrot.lane.b32.xlu0 %v276_v33, %s334_s5  ;;  %204 = vrot.lane.b32.xlu1 %v277_v34, %s335_s6 }
  0x38   :  { %211 = vrot.lane.b32.xlu0 %v278_v35, %s336_s0 }
  0x76   :  { %v12_v36 = vpop.permute.xlu0 %11   ;;  %v53_v37 = vpop.permute.xlu1 %52  }
  0x77   :  { %15 = vst.msk [vmem:[#allocation0 + $0x18] sm:$0x1] %vm13_vm1, %v12_v36   ;;  %vm118_vm1 = vcmask 687616  }
  0x78   :  { %18 = vst.msk [vmem:[#allocation0 + $0x10] sm:$0x1] %vm16_vm5, %v12_v36   ;;  %vm145_vm5 = vcmask 523616  }
  0x79   :  { %56 = vst.msk [vmem:[#allocation0 + $0x10] sm:$0x1] %vm9_vm0, %v53_v37   ;;  %vm111_vm0 = vcmask 753216  }
  0x7a   :  { %v26_v38 = vpop.permute.xlu0 %25   ;;  %v39_v39 = vpop.permute.xlu1 %38  }
  0x7b   :  { %29 = vst.msk [vmem:[#allocation0 + $0x8] sm:$0x1] %vm27_vm3, %v26_v38   ;;  %vm131_vm3 = vcmask 622016  }
  0x7c   :  { %31 = vst.msk [vmem:[#allocation0] sm:$0x1] %vm30_vm6, %v26_v38   ;;  %vm152_vm6 = vcmask 490816  }
  0x7d   :  { %59 = vst.msk [vmem:[#allocation0 + $0x8] sm:$0x1] %vm57_vm7, %v53_v37   ;;  %vm158_vm7 = vcmask 458016  }
  0x7e   :  { %42 = vst.msk [vmem:[#allocation0 + $0x20] sm:$0x1] %vm23_vm2, %v39_v39   ;;  %v63_v40 = vpop.permute.xlu0 %62   ;;  %v70_v41 = vpop.permute.xlu1 %69   ;;  %vm125_vm2 = vcmask 654816  }
  0x7f   :  { %45 = vst.msk [vmem:[#allocation0 + $0x18] sm:$0x1] %vm43_vm8, %v39_v39   ;;  %vm165_vm8 = vcmask 425216  }
  0x80   :  { %66 = vst.msk [vmem:[#allocation0 + $0x10] sm:$0x1] %vm64_vm9, %v63_v40   ;;  %vm172_vm9 = vcmask 392416  }
  0x81   :  { %72 = vst.msk [vmem:[#allocation0] sm:$0x1] %vm71_vm10, %v70_v41   ;;  %vm179_vm10 = vcmask 359616  }
  0x82   :  { %v76_v42 = vpop.permute.xlu0 %75   ;;  %v83_v43 = vpop.permute.xlu1 %82  }
  0x83   :  { %79 = vst.msk [vmem:[#allocation0 + $0x18] sm:$0x1] %vm77_vm11, %v76_v42   ;;  %vm186_vm11 = vcmask 326816  }
  0x84   :  { %86 = vst.msk [vmem:[#allocation0 + $0x8] sm:$0x1] %vm84_vm12, %v83_v43   ;;  %vm192_vm12 = vcmask 294016  }
  0x86   :  { %v90_v44 = vpop.permute.xlu0 %89   ;;  %v97_v45 = vpop.permute.xlu1 %96  }
  0x87   :  { %93 = vst.msk [vmem:[#allocation0 + $0x10] sm:$0x1] %vm91_vm13, %v90_v44   ;;  %vm199_vm13 = vcmask 261216  }
  0x88   :  { %99 = vst.msk [vmem:[#allocation0] sm:$0x1] %vm98_vm14, %v97_v45   ;;  %vm206_vm14 = vcmask 228416  }
  0x8a   :  { %v103_v46 = vpop.permute.xlu0 %102   ;;  %v110_v47 = vpop.permute.xlu1 %109  }
  0x8b   :  { %106 = vst.msk [vmem:[#allocation0 + $0x18] sm:$0x1] %vm104_vm15, %v103_v46   ;;  %vm213_vm15 = vcmask 195616  }
  0x8c   :  { %113 = vst.msk [vmem:[#allocation0 + $0x8] sm:$0x1] %vm111_vm0, %v110_v47  }
  0x8e   :  { %v117_v48 = vpop.permute.xlu0 %116   ;;  %v124_v49 = vpop.permute.xlu1 %123  }
  0x8f   :  { %120 = vst.msk [vmem:[#allocation0 + $0x10] sm:$0x1] %vm118_vm1, %v117_v48  }
  0x90   :  { %126 = vst.msk [vmem:[#allocation0] sm:$0x1] %vm125_vm2, %v124_v49  }
  0x92   :  { %v130_v50 = vpop.permute.xlu0 %129   ;;  %v137_v51 = vpop.permute.xlu1 %136  }
  0x93   :  { %133 = vst.msk [vmem:[#allocation0 + $0x18] sm:$0x1] %vm131_vm3, %v130_v50  }
  0x94   :  { %140 = vst.msk [vmem:[#allocation0 + $0x8] sm:$0x1] %vm138_vm4, %v137_v51  }
  0x96   :  { %v144_v52 = vpop.permute.xlu0 %143   ;;  %v151_v53 = vpop.permute.xlu1 %150  }
  0x97   :  { %147 = vst.msk [vmem:[#allocation0 + $0x10] sm:$0x1] %vm145_vm5, %v144_v52  }
  0x98   :  { %153 = vst.msk [vmem:[#allocation0] sm:$0x1] %vm152_vm6, %v151_v53  }
  0x9a   :  { %v157_v54 = vpop.permute.xlu0 %156   ;;  %v164_v55 = vpop.permute.xlu1 %163  }
  0x9b   :  { %160 = vst.msk [vmem:[#allocation0 + $0x18] sm:$0x1] %vm158_vm7, %v157_v54  }
  0x9c   :  { %167 = vst.msk [vmem:[#allocation0 + $0x8] sm:$0x1] %vm165_vm8, %v164_v55  }
  0x9e   :  { %v171_v56 = vpop.permute.xlu0 %170   ;;  %v178_v57 = vpop.permute.xlu1 %177  }
  0x9f   :  { %174 = vst.msk [vmem:[#allocation0 + $0x20] sm:$0x1] %vm172_vm9, %v171_v56  }
  0xa0   :  { %181 = vst.msk [vmem:[#allocation0 + $0x10] sm:$0x1] %vm179_vm10, %v178_v57  }
  0xa2   :  { %v185_v58 = vpop.permute.xlu0 %184   ;;  %v191_v59 = vpop.permute.xlu1 %190  }
  0xa3   :  { %187 = vst.msk [vmem:[#allocation0] sm:$0x1] %vm186_vm11, %v185_v58  }
  0xa4   :  { %194 = vst.msk [vmem:[#allocation0 + $0x18] sm:$0x1] %vm192_vm12, %v191_v59  }
  0xa6   :  { %v198_v60 = vpop.permute.xlu0 %197   ;;  %v205_v61 = vpop.permute.xlu1 %204  }
  0xa7   :  { %201 = vst.msk [vmem:[#allocation0 + $0x8] sm:$0x1] %vm199_vm13, %v198_v60  }
  0xa8   :  { %208 = vst.msk [vmem:[#allocation0 + $0x20] sm:$0x1] %vm206_vm14, %v205_v61  }
  0xaa   :  { %v219_v62 = vld [vmem:[#allocation0] sm:$0x1]  ;;  %v212_v63 = vpop.permute.xlu0 %211  }
  0xab   :  { %221 = vst [vmem:[%s467_s1] sm:$0x1] %v219_v62  ;;  %v234_v0 = vld [vmem:[#allocation0 + $0x18] sm:$0x1]  ;;  %215 = vst.msk [vmem:[#allocation0 + $0x10] sm:$0x1] %vm213_vm15, %v212_v63  }
  0xac   :  { %281 = vst [vmem:[%s467_s1 + $0x3] sm:$0x1] %v234_v0 }
  0xae   :  { %v223_v1 = vld [vmem:[#allocation0 + $0x8] sm:$0x1] }
  0xaf   :  { %279 = vst [vmem:[%s467_s1 + $0x1] sm:$0x1] %v223_v1  ;;  %v240_v2 = vld [vmem:[#allocation0 + $0x20] sm:$0x1] }
  0xb0   :  { %282 = vst [vmem:[%s467_s1 + $0x4] sm:$0x1] %v240_v2 }
  0xb2   :  { %v228_v3 = vld [vmem:[#allocation0 + $0x10] sm:$0x1] }
  0xb3   :  { %280 = vst [vmem:[%s467_s1 + $0x2] sm:$0x1] %v228_v3 }

// kernel: decoder_block_v2_forward.1
= control target key start
LH: loop header
LB: loop body
LE: loop exit
PB: predicated region body
PF: predicated region fallthrough
CT: control target
= control target key end

     0   :  { %s1988_s21 = smov 0   ;;  %s1990_s22 = smov 0   ;;  %s2694_s0 = inlined_call_operand.vmem [shape: bf16[2,1,16,640], index: 0, kind: input, shape index: {}]   ;;  %s2695_s1 = inlined_call_operand.vmem [shape: f32[1,560], index: 1, kind: input, shape index: {}]   ;;  %s2696_s2 = inlined_call_operand.vmem [shape: bf16[16,144], index: 2, kind: input, shape index: {}]   ;;  %s2697_s3 = inlined_call_operand.vmem [shape: f32[16,1], index: 3, kind: input, shape index: {}]   ;;  %s2698_s4 = inlined_call_operand.vmem [shape: bf16[2,2,8,64], index: 4, kind: input, shape index: {}]   ;;  %s2699_s5 = inlined_call_operand.vmem [shape: f32[8,1], index: 5, kind: input, shape index: {}]   ;;  %s2700_s6 = inlined_call_operand.vmem [shape: bf16[2,1,2,2,8,480], index: 6, kind: output, shape index: {}]  }
   0x1   :  { %s1992_s23 = smov 0  }
   0x2 LB: > { %s28_s24 = sadd.s32 1, %s1929_s22  ;;  %p1804_p0 = scmp.ge.s32.totalorder %s1933_s23, 1  ;;  %s1933_s23 = sphi %s1992_s23, %s16_s23   ;;  %s1929_s22 = sphi %s1990_s22, %s2704_s22   ;;  %s1925_s21 = sphi %s1988_s21, %s2703_s21  }
   0x3   : > { %p30_p1 = scmp.ge.s32.totalorder %s28_s24, 2  ;;  %p232_p2 = scmp.lt.s32.totalorder %s1933_s23, 3 }
   0x5   : > { %s2706_s24 = smov (%p30_p1, %s28_s24), 0  ;;  %p233_p3 = pnand %p1804_p0, %p232_p2 }
   0x6   : > { %p270_p4 = scmp.lt.s32.totalorder (!%p233_p3), %s1925_s21, 1  ;;  %s1935_s29 = smov (!%p233_p3), 127   ;;  %vm415_vm0 = vcmask (!%p233_p3), 1039360   ;;  %vm430_vm1 = vcmask (!%p233_p3), 1031168   ;;  %vm445_vm2 = vcmask (!%p233_p3), 883712   ;;  %vm460_vm3 = vcmask (!%p233_p3), 875520  }
   0x7   : > { %236 = sbr.rel (%p233_p3) target bundleno = 1187 (0x4a3), region = 44  ;;  %s1936_s30 = smov (!%p233_p3), 126   ;;  %vm475_vm4 = vcmask (!%p233_p3), 867328   ;;  %vm490_vm5 = vcmask (!%p233_p3), 719872   ;;  %vm505_vm6 = vcmask (!%p233_p3), 711680   ;;  %vm520_vm7 = vcmask (!%p233_p3), 703488  }
   0x8   : > { %s1937_s7 = smov (!%p233_p3), 108   ;;  %s1938_s8 = smov (!%p233_p3), 107   ;;  %vm638_vm8 = vcmask (!%p233_p3), 891904   ;;  %vm720_vm9 = vcmask (!%p233_p3), 130048   ;;  %vm918_vm12 = vcmask (!%p233_p3), 7168   ;;  %vm931_vm13 = vcmask (!%p233_p3), 162816  }
   0x9   : > { %s1939_s9 = smov (!%p233_p3), 106   ;;  %s1940_s10 = smov (!%p233_p3), 88   ;;  %vm943_vm14 = vcmask (!%p233_p3), 171008   ;;  %vm1378_vm15 = vcmask (!%p233_p3), 556032  }
   0xa   : > { %s1941_s11 = smov (!%p233_p3), 87   ;;  %s1942_s12 = smov (!%p233_p3), 86  }
   0xb   : > { %s1943_s13 = smov (!%p233_p3), 109  }
   0xe   : > { %s2708_s21 = smov (!%p270_p4, %s1925_s21), 1 }
   0xf   : > { %s1856_s25 = smul.u32 40, %s2708_s21  ;;  %s1847_s19 = sshll.u32 %s2708_s21, 6 }
  0x10   : > { %s2663_s26 = scalar_lea.vmem %s2700_s6, %s1847_s19 }
  0x11   : > { %s2012_s28 = scalar_lea.vmem %s2694_s0, %s1856_s25 }
  0x12   : > { %v1901_v0 = vld [vmem:[%s2012_s28 + $0xc] ss:$20 sps:$4 sm:$0xff]   ;;  %v1903_v1 = vld [vmem:[%s2012_s28 + $0x4] ss:$20 sps:$4 sm:$0xff]   ;;  %v1905_v3 = vld [vmem:[%s2012_s28 + $0x8] ss:$20 sps:$4 sm:$0xff]  }
  0x13   : > { %411 = vrot.lane.b32.xlu1 %v1901_v0, %s1935_s29  ;;  %v1906_v2 = vld [vmem:[%s2012_s28] ss:$20 sps:$4 sm:$0xff]   ;;  %407 = vrot.lane.b32.xlu0 %v1903_v1, %s1935_s29  ;;  %v1907_v4 = vld [vmem:[%s2012_s28 + $0x10] ss:$20 sps:$4 sm:$0xff]   ;;  %s1948_s28 = smov 1  }
  0x17   : > { %405 = vrot.lane.b32.xlu1 %v1906_v2, %s1935_s29  ;;  %409 = vrot.lane.b32.xlu0 %v1905_v3, %s1935_s29 }
  0x1b   : > { %424 = vrot.lane.b32.xlu1 %v1905_v3, %s1936_s30  ;;  %422 = vrot.lane.b32.xlu0 %v1903_v1, %s1936_s30 }
  0x1f   : > { %420 = vrot.lane.b32.xlu1 %v1906_v2, %s1936_s30  ;;  %426 = vrot.lane.b32.xlu0 %v1901_v0, %s1936_s30 }
  0x23   : > { %439 = vrot.lane.b32.xlu1 %v1905_v3, %s1937_s7  ;;  %437 = vrot.lane.b32.xlu0 %v1903_v1, %s1937_s7 }
  0x27   : > { %435 = vrot.lane.b32.xlu1 %v1906_v2, %s1937_s7  ;;  %441 = vrot.lane.b32.xlu0 %v1901_v0, %s1937_s7 }
  0x2b   : > { %454 = vrot.lane.b32.xlu1 %v1905_v3, %s1938_s8  ;;  %452 = vrot.lane.b32.xlu0 %v1903_v1, %s1938_s8 }
  0x2f   : > { %450 = vrot.lane.b32.xlu1 %v1906_v2, %s1938_s8  ;;  %456 = vrot.lane.b32.xlu0 %v1901_v0, %s1938_s8 }
  0x33   : > { %469 = vrot.lane.b32.xlu1 %v1905_v3, %s1939_s9  ;;  %467 = vrot.lane.b32.xlu0 %v1903_v1, %s1939_s9 }
  0x37   : > { %465 = vrot.lane.b32.xlu1 %v1906_v2, %s1939_s9  ;;  %471 = vrot.lane.b32.xlu0 %v1901_v0, %s1939_s9 }
  0x3b   : > { %482 = vrot.lane.b32.xlu1 %v1903_v1, %s1940_s10  ;;  %413 = vrot.lane.b32.xlu0 %v1907_v4, %s1935_s29  ;;  %s1949_s29 = smov 20  }
  0x3f   : > { %486 = vrot.lane.b32.xlu1 %v1901_v0, %s1940_s10  ;;  %484 = vrot.lane.b32.xlu0 %v1905_v3, %s1940_s10 }
  0x43   : > { %428 = vrot.lane.b32.xlu1 %v1907_v4, %s1936_s30  ;;  %480 = vrot.lane.b32.xlu0 %v1906_v2, %s1940_s10  ;;  %s1950_s30 = smov 21  }
  0x47   : > { %499 = vrot.lane.b32.xlu1 %v1905_v3, %s1941_s11  ;;  %497 = vrot.lane.b32.xlu0 %v1903_v1, %s1941_s11 }
  0x4b   : > { %495 = vrot.lane.b32.xlu1 %v1906_v2, %s1941_s11  ;;  %501 = vrot.lane.b32.xlu0 %v1901_v0, %s1941_s11 }
  0x4f   : > { %512 = vrot.lane.b32.xlu1 %v1903_v1, %s1942_s12  ;;  %443 = vrot.lane.b32.xlu0 %v1907_v4, %s1937_s7  ;;  %s1951_s7 = smov 68  }
  0x53   : > { %516 = vrot.lane.b32.xlu1 %v1901_v0, %s1942_s12  ;;  %514 = vrot.lane.b32.xlu0 %v1905_v3, %s1942_s12 }
  0x57   : > { %458 = vrot.lane.b32.xlu1 %v1907_v4, %s1938_s8  ;;  %510 = vrot.lane.b32.xlu0 %v1906_v2, %s1942_s12  ;;  %s1952_s8 = smov 67  }
  0x5b   : > { %488 = vrot.lane.b32.xlu1 %v1907_v4, %s1940_s10  ;;  %473 = vrot.lane.b32.xlu0 %v1907_v4, %s1939_s9 }
  0x5f   : > { %518 = vrot.lane.b32.xlu1 %v1907_v4, %s1942_s12  ;;  %503 = vrot.lane.b32.xlu0 %v1907_v4, %s1941_s11 }
  0x63   : > { %552 = vrot.lane.b32.xlu1 %v1905_v3, %s1943_s13  ;;  %550 = vrot.lane.b32.xlu0 %v1903_v1, %s1943_s13 }
  0x67   : > { %554 = vrot.lane.b32.xlu1 %v1901_v0, %s1943_s13  ;;  %548 = vrot.lane.b32.xlu0 %v1906_v2, %s1943_s13 }
  0x6b   : > { %556 = vrot.lane.b32.xlu0 %v1907_v4, %s1943_s13 }
  0x85   : > { %v412_v5 = vpop.permute.xlu1 %411  ;;  %v408_v6 = vpop.permute.xlu0 %407 }
  0x89   : > { %v406_v7 = vpop.permute.xlu1 %405  ;;  %v410_v8 = vpop.permute.xlu0 %409 }
  0x8a   : > { %v418_v9 = vsel %vm415_vm0, %v410_v8, %v412_v5  ;;  %v417_v37 = vsel %vm415_vm0, %v408_v6, %v410_v8  ;;  %v416_v41 = vsel %vm415_vm0, %v406_v7, %v408_v6 }
  0x8b   : > { %562 = vrot.lane.b32.xlu0 %v418_v9, %s1943_s13 }
  0x8d   : > { %v425_v10 = vpop.permute.xlu1 %424  ;;  %v423_v11 = vpop.permute.xlu0 %422 }
  0x8e   : > { %v432_v12 = vsel %vm430_vm1, %v423_v11, %v425_v10 }
  0x8f   : > { %570 = vrot.lane.b32.xlu0 %v432_v12, %s1943_s13  ;;  %v2123_v12 = vld [vmem:[%s2696_s2 + $0x4] ss:$8 sps:$4 sm:$0xff]  }
  0x90   : > { %1817 = vmatprep.mubr.msk.bf16.mxu0 %vm720_vm9, %v2123_v12  ;;  %1818 = vmatprep.mubr.msk.bf16.mxu1 %vm720_vm9, %v2123_v12 }
  0x91   : > { %v421_v13 = vpop.permute.xlu1 %420  ;;  %v2048_v14 = vpop.permute.xlu0 %426 }
  0x92   : > { %v431_v15 = vsel %vm430_vm1, %v421_v13, %v423_v11  ;;  %v433_v45 = vsel %vm430_vm1, %v425_v10, %v2048_v14 }
  0x93   : > { %568 = vrot.lane.b32.xlu0 %v431_v15, %s1943_s13 }
  0x95   : > { %v440_v16 = vpop.permute.xlu1 %439  ;;  %v438_v17 = vpop.permute.xlu0 %437 }
  0x96   : > { %v447_v48 = vsel %vm445_vm2, %v438_v17, %v440_v16 }
  0x99   : > { %v436_v18 = vpop.permute.xlu1 %435  ;;  %v442_v19 = vpop.permute.xlu0 %441 }
  0x9a   : > { %v448_v20 = vsel %vm445_vm2, %v440_v16, %v442_v19  ;;  %v446_v52 = vsel %vm445_vm2, %v436_v18, %v438_v17  ;;  %v1944_v17 = vmov 0  }
  0x9b   : > { %582 = vrot.lane.b32.xlu0 %v448_v20, %s1943_s13  ;;  %1899 = vset.pattern.permute.xlu1 %v1944_v17 }
  0x9c   : > { %1900 = vset.pattern.permute.xlu0 %v1944_v17 }
  0x9d   : > { %v455_v21 = vpop.permute.xlu1 %454  ;;  %v453_v22 = vpop.permute.xlu0 %452 }
  0x9e   : > { %v462_v23 = vsel %vm460_vm3, %v453_v22, %v455_v21 }
  0x9f   : > { %590 = vrot.lane.b32.xlu0 %v462_v23, %s1943_s13 }
  0xa1   : > { %v451_v24 = vpop.permute.xlu1 %450  ;;  %v2056_v25 = vpop.permute.xlu0 %456 }
  0xa2   : > { %v461_v26 = vsel %vm460_vm3, %v451_v24, %v453_v22  ;;  %v463_v56 = vsel %vm460_vm3, %v455_v21, %v2056_v25 }
  0xa3   : > { %588 = vrot.lane.b32.xlu0 %v461_v26, %s1943_s13  ;;  %v528_v26 = vld [vmem:[%s2697_s3 + $0x8] sm:$0xff] }
  0xa5   : > { %v470_v27 = vpop.permute.xlu1 %469  ;;  %v468_v28 = vpop.permute.xlu0 %467 }
  0xa6   : > { %v477_v60 = vsel %vm475_vm4, %v468_v28, %v470_v27 }
  0xa9   : > { %v466_v29 = vpop.permute.xlu1 %465  ;;  %v2060_v30 = vpop.permute.xlu0 %471 }
  0xaa   : > { %v478_v31 = vsel %vm475_vm4, %v470_v27, %v2060_v30  ;;  %v476_v0 = vsel %vm475_vm4, %v466_v29, %v468_v28 }
  0xab   : > { %602 = vrot.lane.b32.xlu0 %v478_v31, %s1943_s13 }
  0xad   : > { %v483_v32 = vpop.permute.xlu1 %482  ;;  %v414_v33 = vpop.permute.xlu0 %413 }
  0xae   : > { %566 = vrot.lane.b32.xlu1 %v414_v33, %s1943_s13  ;;  %v419_v34 = vsel %vm415_vm0, %v412_v5, %v414_v33  ;;  %vm1025_vm0 = vcmask 523264  }
  0xaf   : > { %564 = vrot.lane.b32.xlu0 %v419_v34, %s1943_s13 }
  0xb1   : > { %v2068_v35 = vpop.permute.xlu1 %486  ;;  %v485_v36 = vpop.permute.xlu0 %484 }
  0xb2   : > { %560 = vrot.lane.b32.xlu1 %v417_v37, %s1943_s13  ;;  %v492_v38 = vsel %vm490_vm5, %v483_v32, %v485_v36  ;;  %v493_v2 = vsel %vm490_vm5, %v485_v36, %v2068_v35 }
  0xb3   : > { %610 = vrot.lane.b32.xlu0 %v492_v38, %s1943_s13 }
  0xb5   : > { %v429_v39 = vpop.permute.xlu1 %428  ;;  %v481_v40 = vpop.permute.xlu0 %480 }
  0xb6   : > { %558 = vrot.lane.b32.xlu1 %v416_v41, %s1943_s13  ;;  %v491_v42 = vsel %vm490_vm5, %v481_v40, %v483_v32  ;;  %v434_v5 = vsel %vm430_vm1, %v2048_v14, %v429_v39  ;;  %vm1567_vm1 = vcmask 547840  }
  0xb7   : > { %608 = vrot.lane.b32.xlu0 %v491_v42, %s1943_s13 }
  0xb9   : > { %v500_v43 = vpop.permute.xlu1 %499  ;;  %v498_v44 = vpop.permute.xlu0 %497 }
  0xba   : > { %572 = vrot.lane.b32.xlu1 %v433_v45, %s1943_s13  ;;  %v507_v8 = vsel %vm505_vm6, %v498_v44, %v500_v43 }
  0xbb   : > { %576 = vrot.lane.b32.xlu0 %v429_v39, %s1943_s13 }
  0xbd   : > { %v496_v46 = vpop.permute.xlu1 %495  ;;  %v2082_v47 = vpop.permute.xlu0 %501 }
  0xbe   : > { %580 = vrot.lane.b32.xlu1 %v447_v48, %s1943_s13  ;;  %v508_v49 = vsel %vm505_vm6, %v500_v43, %v2082_v47  ;;  %v506_v13 = vsel %vm505_vm6, %v496_v46, %v498_v44 }
  0xbf   : > { %622 = vrot.lane.b32.xlu0 %v508_v49, %s1943_s13 }
  0xc1   : > { %v513_v50 = vpop.permute.xlu1 %512  ;;  %v444_v51 = vpop.permute.xlu0 %443 }
  0xc2   : > { %578 = vrot.lane.b32.xlu1 %v446_v52, %s1943_s13  ;;  %v449_v53 = vsel %vm445_vm2, %v442_v19, %v444_v51  ;;  %vm1132_vm2 = vcmask 1043456  }
  0xc3   : > { %584 = vrot.lane.b32.xlu0 %v449_v53, %s1943_s13 }
  0xc5   : > { %v2093_v54 = vpop.permute.xlu1 %516  ;;  %v515_v55 = vpop.permute.xlu0 %514 }
  0xc6   : > { %592 = vrot.lane.b32.xlu1 %v463_v56, %s1943_s13  ;;  %v522_v57 = vsel %vm520_vm7, %v513_v50, %v515_v55  ;;  %v523_v18 = vsel %vm520_vm7, %v515_v55, %v2093_v54 }
  0xc7   : > { %630 = vrot.lane.b32.xlu0 %v522_v57, %s1943_s13 }
  0xc9   : > { %v459_v58 = vpop.permute.xlu1 %458  ;;  %v511_v59 = vpop.permute.xlu0 %510 }
  0xca   : > { %600 = vrot.lane.b32.xlu1 %v477_v60, %s1943_s13  ;;  %v521_v61 = vsel %vm520_vm7, %v511_v59, %v513_v50  ;;  %v464_v19 = vsel %vm460_vm3, %v2056_v25, %v459_v58  ;;  %v527_v25 = vld [vmem:[%s2697_s3] sm:$0xff]  ;;  %vm1133_vm3 = vcmask 785412  }
  0xcb   : > { %628 = vrot.lane.b32.xlu0 %v521_v61, %s1943_s13 }
  0xcd   : > { %v489_v62 = vpop.permute.xlu1 %488  ;;  %v474_v63 = vpop.permute.xlu0 %473 }
  0xce   : > { %598 = vrot.lane.b32.xlu1 %v476_v0, %s1943_s13  ;;  %v479_v20 = vsel %vm475_vm4, %v2060_v30, %v474_v63  ;;  %v494_v21 = vsel %vm490_vm5, %v2068_v35, %v489_v62  ;;  %vm2666_vm4 = vmor %vm1133_vm3, %vm1132_vm2 }
  0xcf   : > { %596 = vrot.lane.b32.xlu0 %v459_v58, %s1943_s13 }
  0xd1   : > { %v519_v1 = vpop.permute.xlu1 %518  ;;  %v504_v3 = vpop.permute.xlu0 %503 }
  0xd2   : > { %612 = vrot.lane.b32.xlu1 %v493_v2, %s1943_s13  ;;  %v509_v22 = vsel %vm505_vm6, %v2082_v47, %v504_v3  ;;  %v524_v23 = vsel %vm520_vm7, %v2093_v54, %v519_v1 }
  0xd3   : > { %606 = vrot.lane.b32.xlu0 %v474_v63, %s1943_s13 }
  0xd5   : > { %v553_v4 = vpop.permute.xlu1 %552  ;;  %v551_v6 = vpop.permute.xlu0 %550 }
  0xd6   : > { %574 = vrot.lane.b32.xlu1 %v434_v5, %s1943_s13  ;;  %v640_v7 = vsel %vm638_vm8, %v551_v6, %v553_v4 }
  0xd7   : > { %616 = vrot.lane.b32.xlu0 %v489_v62, %s1943_s13  ;;  %724 = vmatprep.subr.bf16.mxu0 %v640_v7 }
  0xd9   : > { %v549_v9 = vpop.permute.xlu0 %548  ;;  %v555_v11 = vpop.permute.xlu1 %554 }
  0xda   : > { %620 = vrot.lane.b32.xlu1 %v507_v8, %s1943_s13  ;;  %v639_v10 = vsel %vm638_vm8, %v549_v9, %v551_v6  ;;  %v641_v15 = vsel %vm638_vm8, %v553_v4, %v555_v11 }
  0xdb   : > { %626 = vrot.lane.b32.xlu0 %v504_v3, %s1943_s13  ;;  %725 = vmatpush1.bf16.msra.mxu0 %v639_v10 }
  0xdd   : > { %v2126_v14 = vpop.permute.xlu0 %556 }
  0xde   : > { %618 = vrot.lane.b32.xlu1 %v506_v13, %s1943_s13  ;;  %v642_v16 = vsel %vm638_vm8, %v555_v11, %v2126_v14 }
  0xdf   : > { %636 = vrot.lane.b32.xlu0 %v519_v1, %s1943_s13  ;;  %767 = vmatprep.subr.bf16.mxu1 %v642_v16 }
  0xe0   : > { %768 = vmatpush1.bf16.msra.mxu1 %v641_v15 }
  0xe2   : > { %586 = vrot.lane.b32.xlu1 %v444_v51, %s1943_s13 }
  0xe3   : > { %536 = vperm.xlu0 %1900, %v528_v26  }
  0xe6   : > { %632 = vrot.lane.b32.xlu1 %v523_v18, %s1943_s13 }
  0xea   : > { %594 = vrot.lane.b32.xlu1 %v464_v19, %s1943_s13  ;;  %v1910_v19 = vld [vmem:[%s2696_s2] ss:$8 sps:$4 sm:$0xff]  }
  0xee   : > { %604 = vrot.lane.b32.xlu1 %v479_v20, %s1943_s13 }
  0xf2   : > { %614 = vrot.lane.b32.xlu1 %v494_v21, %s1943_s13 }
  0xf6   : > { %624 = vrot.lane.b32.xlu1 %v509_v22, %s1943_s13 }
  0xfa   : > { %634 = vrot.lane.b32.xlu1 %v524_v23, %s1943_s13 }
  0xfd   : > { %v563_v24 = vpop.permute.xlu0 %562 }
  0xfe   : > { %531 = vperm.xlu1 %1899, %v527_v25  }
 0x101   : > { %v571_v27 = vpop.permute.xlu0 %570 }
 0x105   : > { %v569_v28 = vpop.permute.xlu0 %568 }
 0x106   : > { %v647_v44 = vsel %vm638_vm8, %v569_v28, %v571_v27 }
 0x10d   : > { %v2164_v29 = vpop.permute.xlu0 %582 }
 0x111   : > { %v591_v30 = vpop.permute.xlu0 %590 }
 0x115   : > { %v589_v31 = vpop.permute.xlu0 %588 }
 0x116   : > { %v655_v53 = vsel %vm638_vm8, %v589_v31, %v591_v30 }
 0x11d   : > { %v2166_v32 = vpop.permute.xlu0 %602 }
 0x120   : > { %v2168_v33 = vpop.permute.xlu1 %566 }
 0x121   : > { %v565_v34 = vpop.permute.xlu0 %564 }
 0x122   : > { %v646_v35 = vsel %vm638_vm8, %v565_v34, %v2168_v33  ;;  %v645_v36 = vsel %vm638_vm8, %v563_v24, %v565_v34 }
 0x123   : > { %769 = vmatprep.subr.bf16.mxu1 %v646_v35 }
 0x124   : > { %770 = vmatpush1.bf16.msra.mxu1 %v645_v36  ;;  %v561_v37 = vpop.permute.xlu1 %560  ;;  %v295_v36 = vlaneseq }
 0x125   : > { %v644_v38 = vsel %vm638_vm8, %v561_v37, %v563_v24  ;;  %v611_v41 = vpop.permute.xlu0 %610 }
 0x126   : > { %726 = vmatprep.subr.bf16.mxu0 %v644_v38 }
 0x128   : > { %v559_v39 = vpop.permute.xlu1 %558 }
 0x129   : > { %v643_v40 = vsel %vm638_vm8, %v559_v39, %v561_v37  ;;  %v609_v47 = vpop.permute.xlu0 %608  ;;  %v296_v37 = vand.u32 127, %v295_v36  ;;  %v1945_v39 = vmov 1966171168  }
 0x12a   : > { %727 = vmatpush1.bf16.msra.mxu0 %v643_v40  ;;  %v663_v62 = vsel %vm638_vm8, %v609_v47, %v611_v41  ;;  %v346_v40 = vunpack.c.l.s4 %v1945_v39 }
 0x12b   : > { %v299_v38 = vadd.s32 384, %v296_v37  ;;  %vm312_vm10 = vcmp.ge.s32.totalorder %v296_v37, 40 }
 0x12c   : > { %v573_v42 = vpop.permute.xlu1 %572 }
 0x12d   : > { %v648_v43 = vsel %vm638_vm8, %v571_v27, %v573_v42  ;;  %v2180_v50 = vpop.permute.xlu0 %576  ;;  %vm321_vm11 = vcmp.lt.s32.totalorder %v299_v38, 440 }
 0x12e   : > { %728 = vmatprep.subr.bf16.mxu0 %v648_v43  ;;  %v1946_v43 = vmov 0.0  }
 0x12f   : > { %729 = vmatpush1.bf16.msra.mxu0 %v647_v44  ;;  %v1808_v44 = vsel %vm312_vm10, 1.0, %v1946_v43 }
 0x130   : > { %v581_v45 = vpop.permute.xlu1 %580 }
 0x131   : > { %v652_v46 = vsel %vm638_vm8, %v581_v45, %v2164_v29  ;;  %v2186_v56 = vpop.permute.xlu0 %622 }
 0x132   : > { %730 = vmatprep.subr.bf16.mxu0 %v652_v46  ;;  %v1947_v46 = vmov 1.0  }
 0x133   : > { %v343_v47 = vcombine.low %v1808_v44, %v1947_v46 }
 0x134   : > { %v579_v48 = vpop.permute.xlu1 %578 }
 0x135   : > { %v651_v49 = vsel %vm638_vm8, %v579_v48, %v581_v45  ;;  %v585_v59 = vpop.permute.xlu0 %584  ;;  %v1809_v45 = vsel %vm321_vm11, 1.0, %v1946_v43 }
 0x136   : > { %731 = vmatpush1.bf16.msra.mxu0 %v651_v49  ;;  %v653_v11 = vsel %vm638_vm8, %v2164_v29, %v585_v59  ;;  %v344_v48 = vcombine.low %v1947_v46, %v1809_v45 }
 0x138   : > { %v593_v51 = vpop.permute.xlu1 %592 }
 0x139   : > { %v656_v52 = vsel %vm638_vm8, %v591_v30, %v593_v51  ;;  %v631_v0 = vpop.permute.xlu0 %630 }
 0x13a   : > { %732 = vmatprep.subr.bf16.mxu0 %v656_v52 }
 0x13b   : > { %733 = vmatpush1.bf16.msra.mxu0 %v655_v53 }
 0x13c   : > { %v601_v54 = vpop.permute.xlu1 %600 }
 0x13d   : > { %v660_v55 = vsel %vm638_vm8, %v601_v54, %v2166_v32  ;;  %v629_v5 = vpop.permute.xlu0 %628 }
 0x13e   : > { %734 = vmatprep.subr.bf16.mxu0 %v660_v55  ;;  %v671_v18 = vsel %vm638_vm8, %v629_v5, %v631_v0 }
 0x140   : > { %v599_v57 = vpop.permute.xlu1 %598 }
 0x141   : > { %v659_v58 = vsel %vm638_vm8, %v599_v57, %v601_v54  ;;  %v597_v8 = vpop.permute.xlu0 %596  ;;  %v310_v57 = vld [vmem:[%s2695_s1] sm:$0x1f] }
 0x142   : > { %735 = vmatpush1.bf16.msra.mxu0 %v659_v58 }
 0x144   : > { %v613_v60 = vpop.permute.xlu1 %612 }
 0x145   : > { %v664_v61 = vsel %vm638_vm8, %v611_v41, %v613_v60  ;;  %v607_v15 = vpop.permute.xlu0 %606  ;;  %v347_v41 = vunpack.c.0.s8 %v346_v40 }
 0x146   : > { %736 = vmatprep.subr.bf16.mxu0 %v664_v61 }
 0x147   : > { %737 = vmatpush1.bf16.msra.mxu0 %v663_v62 }
 0x148   : > { %v575_v63 = vpop.permute.xlu1 %574 }
 0x149   : > { %v650_v1 = vsel %vm638_vm8, %v575_v63, %v2180_v50  ;;  %v649_v2 = vsel %vm638_vm8, %v573_v42, %v575_v63  ;;  %v617_v23 = vpop.permute.xlu0 %616  ;;  %v2233_v42 = vshrl.u32 %v295_v36, 7 }
 0x14a   : > { %771 = vmatprep.subr.bf16.mxu1 %v650_v1 }
 0x14b   : > { %772 = vmatpush1.bf16.msra.mxu1 %v649_v2  ;;  %v350_v49 = vsub.s32 %v347_v41, %v2233_v42  ;;  %v868_v61 = vsub.s32 1, %v2233_v42 }
 0x14c   : > { %v621_v3 = vpop.permute.xlu1 %620 }
 0x14d   : > { %v668_v4 = vsel %vm638_vm8, %v621_v3, %v2186_v56  ;;  %v627_v28 = vpop.permute.xlu0 %626  ;;  %v365_v52 = vrot.slane %v1946_v43, %v350_v49  ;;  %v880_v43 = vsub.s32 4, %v2233_v42 }
 0x14e   : > { %738 = vmatprep.subr.bf16.mxu0 %v668_v4 }
 0x14f   : > { %v380_v55 = vrot.slane %v365_v52, %v350_v49 }
 0x150   : > { %v619_v6 = vpop.permute.xlu1 %618 }
 0x151   : > { %v667_v7 = vsel %vm638_vm8, %v619_v6, %v621_v3 }
 0x152   : > { %739 = vmatpush1.bf16.msra.mxu0 %v667_v7 }
 0x154   : > { %v587_v9 = vpop.permute.xlu1 %586 }
 0x155   : > { %v654_v10 = vsel %vm638_vm8, %v585_v59, %v587_v9  ;;  %v864_v59 = vsub.s32 0, %v2233_v42 }
 0x156   : > { %773 = vmatprep.subr.bf16.mxu1 %v654_v10 }
 0x157   : > { %774 = vmatpush1.bf16.msra.mxu1 %v653_v11 }
 0x158   : > { %v633_v13 = vpop.permute.xlu1 %632 }
 0x159   : > { %v672_v16 = vsel %vm638_vm8, %v631_v0, %v633_v13 }
 0x15a   : > { %740 = vmatprep.subr.bf16.mxu0 %v672_v16 }
 0x15b   : > { %741 = vmatpush1.bf16.msra.mxu0 %v671_v18 }
 0x15c   : > { %v595_v20 = vpop.permute.xlu1 %594  ;;  %810 = vmatprep.subr.bf16.mxu0 %v1944_v17 }
 0x15d   : > { %v658_v21 = vsel %vm638_vm8, %v595_v20, %v597_v8  ;;  %v657_v22 = vsel %vm638_vm8, %v593_v51, %v595_v20  ;;  %v358_v51 = vrot.slane %v344_v48, %v350_v49 }
 0x15e   : > { %775 = vmatprep.subr.bf16.mxu1 %v658_v21  ;;  %757 = vmatmul.mubr.bf16.vlgmr.msra.gmra.mrb[0].mxu0 %v1910_v19 }
 0x15f   : > { %776 = vmatpush1.bf16.msra.mxu1 %v657_v22  ;;  %811 = vmatpush1.bf16.msra.mxu0 %v2126_v14  ;;  %v872_v22 = vsub.s32 2, %v2233_v42 }
 0x160   : > { %v605_v24 = vpop.permute.xlu1 %604  ;;  %812 = vmatprep.subr.bf16.mxu0 %v1944_v17  ;;  %1819 = vmatprep.mubr.msk.bf16.mxu0 %vm720_vm9, %v2123_v12 }
 0x161   : > { %v662_v25 = vsel %vm638_vm8, %v605_v24, %v607_v15  ;;  %v661_v26 = vsel %vm638_vm8, %v2166_v32, %v605_v24  ;;  %v637_v32 = vpop.permute.xlu0 %636  ;;  %v876_v24 = vsub.s32 3, %v2233_v42 }
 0x162   : > { %777 = vmatprep.subr.bf16.mxu1 %v662_v25 }
 0x163   : > { %778 = vmatpush1.bf16.msra.mxu1 %v661_v26  ;;  %813 = vmatpush1.bf16.msra.mxu0 %v2168_v33 }
 0x164   : > { %v615_v27 = vpop.permute.xlu1 %614  ;;  %814 = vmatprep.subr.bf16.mxu0 %v1944_v17 }
 0x165   : > { %v666_v14 = vsel %vm638_vm8, %v615_v27, %v617_v23  ;;  %v665_v29 = vsel %vm638_vm8, %v613_v60, %v615_v27  ;;  %v537_v63 = vpop.permute.xlu0 %536 }
 0x166   : > { %779 = vmatprep.subr.bf16.mxu1 %v666_v14 }
 0x167   : > { %780 = vmatpush1.bf16.msra.mxu1 %v665_v29  ;;  %815 = vmatpush1.bf16.msra.mxu0 %v2180_v50  ;;  %v351_v50 = vrot.slane %v343_v47, %v350_v49 }
 0x168   : > { %v625_v12 = vpop.permute.xlu1 %624  ;;  %816 = vmatprep.subr.bf16.mxu0 %v1944_v17 }
 0x169   : > { %v670_v30 = vsel %vm638_vm8, %v625_v12, %v627_v28  ;;  %v669_v31 = vsel %vm638_vm8, %v2186_v56, %v625_v12  ;;  %v366_v53 = vcombine.low %v351_v50, %v358_v51 }
 0x16a   : > { %781 = vmatprep.subr.bf16.mxu1 %v670_v30 }
 0x16b   : > { %782 = vmatpush1.bf16.msra.mxu1 %v669_v31  ;;  %817 = vmatpush1.bf16.msra.mxu0 %v587_v9  ;;  %v373_v54 = vrot.slane %v366_v53, %v350_v49 }
 0x16c   : > { %v635_v33 = vpop.permute.xlu1 %634  ;;  %818 = vmatprep.subr.bf16.mxu0 %v1944_v17 }
 0x16d   : > { %v674_v34 = vsel %vm638_vm8, %v635_v33, %v637_v32  ;;  %v673_v35 = vsel %vm638_vm8, %v633_v13, %v635_v33  ;;  %v381_v56 = vcombine.low %v373_v54, %v380_v55 }
 0x16e   : > { %783 = vmatprep.subr.bf16.mxu1 %v674_v34 }
 0x16f   : > { %784 = vmatpush1.bf16.msra.mxu1 %v673_v35  ;;  %819 = vmatpush1.bf16.msra.mxu0 %v597_v8  ;;  %v383_v58 = vmul.f32 %v381_v56, %v310_v57 }
 0x170   : > { %820 = vmatprep.subr.bf16.mxu0 %v1944_v17 }
 0x171   : > { %v865_v1 = vrot.slane %v383_v58, %v864_v59  ;;  %v869_v5 = vrot.slane %v383_v58, %v868_v61  ;;  %v873_v29 = vrot.slane %v383_v58, %v872_v22  ;;  %v881_v46 = vrot.slane %v383_v58, %v880_v43 }
 0x172   : > { %800 = vmatmul.mubr.bf16.vlgmr.msra.gmra.mrb[0].mxu1 %v1910_v19 }
 0x173   : > { %821 = vmatpush1.bf16.msra.mxu0 %v607_v15  ;;  %1061 = vmatprep.mubr.bf16.mxu1 %v1944_v17 }
 0x174   : > { %822 = vmatprep.subr.bf16.mxu0 %v1944_v17 }
 0x177   : > { %823 = vmatpush1.bf16.msra.mxu0 %v617_v23 }
 0x178   : > { %824 = vmatprep.subr.bf16.mxu0 %v1944_v17 }
 0x17b   : > { %825 = vmatpush1.bf16.msra.mxu0 %v627_v28 }
 0x17c   : > { %826 = vmatprep.subr.bf16.mxu0 %v1944_v17 }
 0x17d   : > { %v532_v60 = vpop.permute.xlu1 %531 }
 0x17f   : > { %827 = vmatpush1.bf16.msra.mxu0 %v637_v32  ;;  %v877_v32 = vrot.slane %v383_v58, %v876_v24 }
 0x182   : > { %843 = vmatmul.mubr.bf16.vlgmr.msra.gmra.mrb[4].mxu0 %v1910_v19 }
 0x183   : > { %1292 = vmatprep.mubr.bf16.mxu0 %v1944_v17 }
 0x231   : > { %v758_v62 = vpop.f32.mrb[0].mxu0 }
 0x232   : > { %v760_v0 = vpop.f32.mrb[1].mxu0  ;;  %v759_v2 = vadd.f32 %v758_v62, %v532_v60 }
 0x233   : > { %v762_v3 = vpop.f32.mrb[2].mxu0  ;;  %v761_v4 = vadd.f32 %v760_v0, %v532_v60 }
 0x234   : > { %v763_v6 = vadd.f32 %v762_v3, %v537_v63  ;;  %v851_v7 = vmax.f32 %v759_v2, 0.0  ;;  %v764_v8 = vpop.f32.mrb[3].mxu0 }
 0x235   : > { %v765_v9 = vadd.f32 %v764_v8, %v537_v63  ;;  %v852_v10 = vmax.f32 %v761_v4, 0.0 }
 0x236   : > { %v856_v11 = vmax.f32 %v763_v6, 0.0  ;;  %v887_v13 = vmul.f32 %v865_v1, %v851_v7 }
 0x237   : > { %v857_v15 = vmax.f32 %v765_v9, 0.0  ;;  %v888_v16 = vmul.f32 %v869_v5, %v852_v10 }
 0x238   : > { %v892_v18 = vmul.f32 %v865_v1, %v856_v11 }
 0x239   : > { %v893_v19 = vmul.f32 %v869_v5, %v857_v15 }
 0x23a   : > { %v2241_v20 = vpack.c.bf16 %v892_v18, %v887_v13 }
 0x23b   : > { %v2243_v21 = vpack.c.bf16 %v893_v19, %v888_v16 }
 0x23c   : > { %908 = vrot.lane.b32.xlu1 %v2241_v20, %s1948_s28 }
 0x240   : > { %923 = vrot.lane.b32.xlu1 %v2241_v20, %s1949_s29 }
 0x245   : > { %v801_v23 = vpop.f32.mrb[0].mxu1 }
 0x246   : > { %v802_v25 = vadd.f32 %v801_v23, %v532_v60  ;;  %v803_v26 = vpop.f32.mrb[1].mxu1 }
 0x247   : > { %v804_v27 = vadd.f32 %v803_v26, %v532_v60  ;;  %v805_v28 = vpop.f32.mrb[2].mxu1 }
 0x248   : > { %v853_v14 = vmax.f32 %v802_v25, 0.0  ;;  %v806_v12 = vadd.f32 %v805_v28, %v537_v63  ;;  %v807_v30 = vpop.f32.mrb[3].mxu1 }
 0x249   : > { %v854_v31 = vmax.f32 %v804_v27, 0.0  ;;  %v808_v33 = vadd.f32 %v807_v30, %v537_v63 }
 0x24a   : > { %v858_v34 = vmax.f32 %v806_v12, 0.0  ;;  %v889_v36 = vmul.f32 %v873_v29, %v853_v14 }
 0x24b   : > { %v859_v35 = vmax.f32 %v808_v33, 0.0  ;;  %v890_v38 = vmul.f32 %v877_v32, %v854_v31 }
 0x24c   : > { %v894_v37 = vmul.f32 %v873_v29, %v858_v34 }
 0x24d   : > { %v895_v39 = vmul.f32 %v877_v32, %v859_v35 }
 0x24e   : > { %v2251_v40 = vpack.c.bf16 %v894_v37, %v889_v36 }
 0x24f   : > { %v2253_v41 = vpack.c.bf16 %v895_v39, %v890_v38 }
 0x250   : > { %912 = vrot.lane.b32.xlu0 %v2251_v40, %s1948_s28  ;;  %927 = vrot.lane.b32.xlu1 %v2251_v40, %s1949_s29 }
 0x254   : > { %935 = vrot.lane.b32.xlu0 %v2241_v20, %s1950_s30  ;;  %957 = vrot.lane.b32.xlu1 %v2251_v40, %s1940_s10 }
 0x255   : > { %v844_v44 = vpop.f32.mrb[4].mxu0 }
 0x256   : > { %v845_v45 = vadd.f32 %v844_v44, %v532_v60  ;;  %v846_v47 = vpop.f32.mrb[5].mxu0 }
 0x257   : > { %v847_v48 = vpop.f32.mrb[6].mxu0 }
 0x258   : > { %v855_v49 = vmax.f32 %v845_v45, 0.0  ;;  %v848_v50 = vadd.f32 %v847_v48, %v537_v63  ;;  %939 = vrot.lane.b32.xlu0 %v2251_v40, %s1950_s30  ;;  %1144 = vrot.lane.b32.xlu1 %v2241_v20, %s1941_s11  ;;  %v849_v42 = vpop.f32.mrb[7].mxu0 }
 0x25a   : > { %v891_v51 = vmul.f32 %v881_v46, %v855_v49  ;;  %v860_v52 = vmax.f32 %v848_v50, 0.0 }
 0x25c   : > { %v896_v53 = vmul.f32 %v881_v46, %v860_v52  ;;  %953 = vrot.lane.b32.xlu0 %v2241_v20, %s1940_s10  ;;  %1338 = vrot.lane.b32.xlu1 %v2241_v20, %s1951_s7 }
 0x25e   : > { %v2272_v54 = vpack.c.bf16 %v896_v53, %v891_v51  ;;  %v1138_v53 = vld [vmem:[%s2699_s5] sm:$0xff] }
 0x260   : > { %1148 = vrot.lane.b32.xlu0 %v2251_v40, %s1941_s11  ;;  %910 = vrot.lane.b32.xlu1 %v2243_v21, %s1948_s28 }
 0x264   : > { %1342 = vrot.lane.b32.xlu0 %v2251_v40, %s1951_s7  ;;  %937 = vrot.lane.b32.xlu1 %v2243_v21, %s1950_s30 }
 0x268   : > { %925 = vrot.lane.b32.xlu0 %v2243_v21, %s1949_s29  ;;  %914 = vrot.lane.b32.xlu1 %v2253_v41, %s1948_s28 }
 0x26c   : > { %941 = vrot.lane.b32.xlu0 %v2253_v41, %s1950_s30  ;;  %929 = vrot.lane.b32.xlu1 %v2253_v41, %s1949_s29 }
 0x270   : > { %955 = vrot.lane.b32.xlu0 %v2243_v21, %s1940_s10  ;;  %959 = vrot.lane.b32.xlu1 %v2253_v41, %s1940_s10 }
 0x274   : > { %916 = vrot.lane.b32.xlu0 %v2272_v54, %s1948_s28  ;;  %1146 = vrot.lane.b32.xlu1 %v2243_v21, %s1941_s11 }
 0x278   : > { %961 = vrot.lane.b32.xlu0 %v2272_v54, %s1940_s10  ;;  %1150 = vrot.lane.b32.xlu1 %v2253_v41, %s1941_s11 }
 0x27c   : > { %1152 = vrot.lane.b32.xlu0 %v2272_v54, %s1941_s11  ;;  %1340 = vrot.lane.b32.xlu1 %v2243_v21, %s1951_s7 }
 0x280   : > { %1346 = vrot.lane.b32.xlu0 %v2272_v54, %s1951_s7  ;;  %1344 = vrot.lane.b32.xlu1 %v2253_v41, %s1951_s7 }
 0x284   : > { %1326 = vrot.lane.b32.xlu1 %v2272_v54, %s1949_s29 }
 0x288   : > { %1329 = vrot.lane.b32.xlu1 %v2272_v54, %s1950_s30 }
 0x2ae   : > { %v2314_v55 = vpop.permute.xlu1 %908 }
 0x2af   : > { %963 = vrot.lane.b32.xlu0 %v2314_v55, %s1940_s10 }
 0x2b2   : > { %v2318_v56 = vpop.permute.xlu1 %923 }
 0x2b3   : > { %973 = vrot.lane.b32.xlu1 %v2318_v56, %s1940_s10 }
 0x2b7   : > { %1164 = vrot.lane.b32.xlu1 %v2318_v56, %s1941_s11 }
 0x2c2   : > { %v913_v57 = vpop.permute.xlu0 %912  ;;  %v2324_v58 = vpop.permute.xlu1 %927 }
 0x2c6   : > { %v2326_v59 = vpop.permute.xlu0 %935  ;;  %v958_v60 = vpop.permute.xlu1 %957 }
 0x2c7   : > { %983 = vrot.lane.b32.xlu0 %v2326_v59, %s1940_s10 }
 0x2ca   : > { %v2330_v61 = vpop.permute.xlu0 %939  ;;  %v1145_v62 = vpop.permute.xlu1 %1144 }
 0x2cb   : > { %1154 = vrot.lane.b32.xlu0 %v2314_v55, %s1941_s11 }
 0x2ce   : > { %v954_v63 = vpop.permute.xlu0 %953  ;;  %v1339_v0 = vpop.permute.xlu1 %1338 }
 0x2cf   : > { %1174 = vrot.lane.b32.xlu0 %v2326_v59, %s1941_s11 }
 0x2d2   : > { %v1149_v1 = vpop.permute.xlu0 %1148  ;;  %v911_v2 = vpop.permute.xlu1 %910 }
 0x2d3   : > { %1348 = vrot.lane.b32.xlu0 %v2314_v55, %s1951_s7  ;;  %v2343_v9 = vsel %vm918_vm12, %v911_v2, %v913_v57  ;;  %v2368_v25 = vsel %vm918_vm12, %v2314_v55, %v911_v2 }
 0x2d6   : > { %v1343_v3 = vpop.permute.xlu0 %1342  ;;  %v938_v4 = vpop.permute.xlu1 %937 }
 0x2d7   : > { %v2372_v26 = vsel %vm943_vm14, %v938_v4, %v2330_v61  ;;  %v944_v36 = vsel %vm943_vm14, %v2326_v59, %v938_v4 }
 0x2da   : > { %v926_v5 = vpop.permute.xlu0 %925  ;;  %v2338_v6 = vpop.permute.xlu1 %914 }
 0x2db   : > { %v2355_v18 = vsel %vm931_vm13, %v2318_v56, %v926_v5  ;;  %v2383_v29 = vsel %vm931_vm13, %v926_v5, %v2324_v58  ;;  %v921_v12 = vsel %vm918_vm12, %v913_v57, %v2338_v6 }
 0x2de   : > { %v942_v7 = vpop.permute.xlu0 %941  ;;  %v930_v8 = vpop.permute.xlu1 %929 }
 0x2df   : > { %1182 = vrot.lane.b32.xlu1 %v942_v7, %s1941_s11  ;;  %981 = vrot.lane.b32.xlu0 %v930_v8, %s1940_s10  ;;  %v934_v39 = vsel %vm931_vm13, %v2324_v58, %v930_v8  ;;  %v946_v46 = vsel %vm943_vm14, %v2330_v61, %v942_v7 }
 0x2e2   : > { %v956_v10 = vpop.permute.xlu0 %955  ;;  %v960_v11 = vpop.permute.xlu1 %959 }
 0x2e3   : > { %v993_v13 = vsel %vm490_vm5, %v954_v63, %v956_v10  ;;  %v2347_v15 = vsel %vm490_vm5, %v958_v60, %v960_v11  ;;  %967 = vrot.lane.b32.xlu1 %v2343_v9, %s1940_s10  ;;  %991 = vrot.lane.b32.xlu0 %v942_v7, %s1940_s10  ;;  %v994_v16 = vsel %vm490_vm5, %v956_v10, %v958_v60 }
 0x2e4   : > { %1029 = vmatprep.subr.bf16.mxu1 %v994_v16 }
 0x2e5   : > { %1030 = vmatpush1.bf16.msra.mxu1 %v993_v13 }
 0x2e6   : > { %v917_v19 = vpop.permute.xlu0 %916  ;;  %v1147_v22 = vpop.permute.xlu1 %1146 }
 0x2e7   : > { %v2358_v23 = vsel %vm505_vm6, %v1145_v62, %v1147_v22  ;;  %975 = vrot.lane.b32.xlu1 %v2355_v18, %s1940_s10  ;;  %1172 = vrot.lane.b32.xlu0 %v930_v8, %s1941_s11  ;;  %v2364_v24 = vsel %vm505_vm6, %v1147_v22, %v1149_v1  ;;  %v922_v50 = vsel %vm918_vm12, %v2338_v6, %v917_v19 }
 0x2ea   : > { %v962_v27 = vpop.permute.xlu0 %961  ;;  %v1151_v28 = vpop.permute.xlu1 %1150 }
 0x2eb   : > { %987 = vrot.lane.b32.xlu1 %v2372_v26, %s1940_s10  ;;  %965 = vrot.lane.b32.xlu0 %v2368_v25, %s1940_s10  ;;  %v2379_v14 = vsel %vm490_vm5, %v960_v11, %v962_v27  ;;  %v1186_v35 = vsel %vm505_vm6, %v1149_v1, %v1151_v28 }
 0x2ee   : > { %v1153_v30 = vpop.permute.xlu0 %1152  ;;  %v1341_v31 = vpop.permute.xlu1 %1340 }
 0x2ef   : > { %v2388_v32 = vsel %vm1378_vm15, %v1339_v0, %v1341_v31  ;;  %969 = vrot.lane.b32.xlu1 %v921_v12, %s1940_s10  ;;  %977 = vrot.lane.b32.xlu0 %v2383_v29, %s1940_s10  ;;  %v1187_v33 = vsel %vm505_vm6, %v1151_v28, %v1153_v30  ;;  %v2395_v34 = vsel %vm1378_vm15, %v1341_v31, %v1343_v3 }
 0x2f0   : > { %1260 = vmatprep.subr.bf16.mxu0 %v1187_v33 }
 0x2f1   : > { %1261 = vmatpush1.bf16.msra.mxu0 %v1186_v35 }
 0x2f2   : > { %v1347_v37 = vpop.permute.xlu0 %1346  ;;  %v1345_v38 = vpop.permute.xlu1 %1344 }
 0x2f3   : > { %v2403_v43 = vsel %vm1378_vm15, %v1343_v3, %v1345_v38  ;;  %979 = vrot.lane.b32.xlu1 %v934_v39, %s1940_s10  ;;  %985 = vrot.lane.b32.xlu0 %v944_v36, %s1940_s10  ;;  %v2408_v44 = vsel %vm1378_vm15, %v1345_v38, %v1347_v37 }
 0x2f6   : > { %v1327_v45 = vpop.permute.xlu1 %1326 }
 0x2f7   : > { %v1328_v47 = vsel %vm931_vm13, %v930_v8, %v1327_v45  ;;  %989 = vrot.lane.b32.xlu1 %v946_v46, %s1940_s10  ;;  %1156 = vrot.lane.b32.xlu0 %v2368_v25, %s1941_s11  ;;  %v902_v8 = vld [vmem:[%s2698_s4] sm:$0xf] }
 0x2fa   : > { %v1330_v48 = vpop.permute.xlu1 %1329 }
 0x2fb   : > { %v1331_v49 = vsel %vm943_vm14, %v942_v7, %v1330_v48  ;;  %1158 = vrot.lane.b32.xlu1 %v2343_v9, %s1941_s11  ;;  %1160 = vrot.lane.b32.xlu0 %v921_v12, %s1941_s11 }
 0x2ff   : > { %1166 = vrot.lane.b32.xlu1 %v2355_v18, %s1941_s11  ;;  %1168 = vrot.lane.b32.xlu0 %v2383_v29, %s1941_s11 }
 0x303   : > { %1170 = vrot.lane.b32.xlu1 %v934_v39, %s1941_s11  ;;  %1176 = vrot.lane.b32.xlu0 %v944_v36, %s1941_s11 }
 0x307   : > { %1178 = vrot.lane.b32.xlu1 %v2372_v26, %s1941_s11  ;;  %1180 = vrot.lane.b32.xlu0 %v946_v46, %s1941_s11 }
 0x30b   : > { %1352 = vrot.lane.b32.xlu1 %v2343_v9, %s1951_s7  ;;  %1350 = vrot.lane.b32.xlu0 %v2368_v25, %s1951_s7 }
 0x30f   : > { %1360 = vrot.lane.b32.xlu1 %v2355_v18, %s1951_s7  ;;  %1354 = vrot.lane.b32.xlu0 %v921_v12, %s1951_s7 }
 0x313   : > { %1364 = vrot.lane.b32.xlu1 %v934_v39, %s1951_s7  ;;  %971 = vrot.lane.b32.xlu0 %v922_v50, %s1940_s10 }
 0x317   : > { %1358 = vrot.lane.b32.xlu1 %v2318_v56, %s1951_s7  ;;  %1362 = vrot.lane.b32.xlu0 %v2383_v29, %s1951_s7 }
 0x31b   : > { %1372 = vrot.lane.b32.xlu1 %v2372_v26, %s1951_s7  ;;  %1370 = vrot.lane.b32.xlu0 %v944_v36, %s1951_s7 }
 0x31f   : > { %1529 = vrot.lane.b32.xlu1 %v2243_v21, %s1952_s8  ;;  %1374 = vrot.lane.b32.xlu0 %v946_v46, %s1951_s7 }
 0x321   : > { %v964_v21 = vpop.permute.xlu0 %963 }
 0x323   : > { %1533 = vrot.lane.b32.xlu1 %v2253_v41, %s1952_s8  ;;  %1368 = vrot.lane.b32.xlu0 %v2326_v59, %s1951_s7 }
 0x325   : > { %v974_v41 = vpop.permute.xlu1 %973 }
 0x327   : > { %1162 = vrot.lane.b32.xlu1 %v922_v50, %s1941_s11  ;;  %1531 = vrot.lane.b32.xlu0 %v2251_v40, %s1952_s8 }
 0x329   : > { %v2488_v51 = vpop.permute.xlu1 %1164 }
 0x32b   : > { %1527 = vrot.lane.b32.xlu1 %v2241_v20, %s1952_s8  ;;  %1535 = vrot.lane.b32.xlu0 %v2272_v54, %s1952_s8 }
 0x32f   : > { %1541 = vrot.lane.b32.xlu1 %v2343_v9, %s1952_s8  ;;  %1539 = vrot.lane.b32.xlu0 %v2368_v25, %s1952_s8 }
 0x333   : > { %1356 = vrot.lane.b32.xlu1 %v922_v50, %s1951_s7  ;;  %1543 = vrot.lane.b32.xlu0 %v921_v12, %s1952_s8 }
 0x337   : > { %1549 = vrot.lane.b32.xlu1 %v2355_v18, %s1952_s8  ;;  %1366 = vrot.lane.b32.xlu0 %v1328_v47, %s1951_s7 }
 0x339   : > { %v984_v20 = vpop.permute.xlu0 %983 }
 0x33b   : > { %1553 = vrot.lane.b32.xlu1 %v934_v39, %s1952_s8  ;;  %1537 = vrot.lane.b32.xlu0 %v2314_v55, %s1952_s8 }
 0x33d   : > { %v2476_v40 = vpop.permute.xlu0 %1154 }
 0x33f   : > { %1551 = vrot.lane.b32.xlu0 %v2383_v29, %s1952_s8  ;;  %1376 = vrot.lane.b32.xlu1 %v1331_v49, %s1951_s7 }
 0x341   : > { %v2481_v42 = vpop.permute.xlu0 %1174 }
 0x343   : > { %1559 = vrot.lane.b32.xlu0 %v944_v36, %s1952_s8  ;;  %1547 = vrot.lane.b32.xlu1 %v2318_v56, %s1952_s8 }
 0x345   : > { %v2490_v52 = vpop.permute.xlu0 %1348 }
 0x347   : > { %1555 = vrot.lane.b32.xlu0 %v1328_v47, %s1952_s8  ;;  %1545 = vrot.lane.b32.xlu1 %v922_v50, %s1952_s8 }
 0x34b   : > { %1563 = vrot.lane.b32.xlu0 %v946_v46, %s1952_s8  ;;  %1561 = vrot.lane.b32.xlu1 %v2372_v26, %s1952_s8 }
 0x34f   : > { %1557 = vrot.lane.b32.xlu0 %v2326_v59, %s1952_s8  ;;  %1565 = vrot.lane.b32.xlu1 %v1331_v49, %s1952_s8 }
 0x351   : > { %v982_v54 = vpop.permute.xlu0 %981  ;;  %v2498_v55 = vpop.permute.xlu1 %1182 }
 0x353   : > { %1141 = vperm.xlu0 %1900, %v1138_v53   ;;  %950 = vperm.xlu1 %1899, %v1138_v53  }
 0x355   : > { %v992_v56 = vpop.permute.xlu0 %991  ;;  %v968_v57 = vpop.permute.xlu1 %967 }
 0x357   : > { %1524 = vperm.xlu0 %1900, %v1138_v53   ;;  %1335 = vperm.xlu1 %1899, %v1138_v53  }
 0x359   : > { %v2500_v58 = vpop.permute.xlu0 %1172  ;;  %v976_v60 = vpop.permute.xlu1 %975 }
 0x35a   : > { %v1001_v3 = vsel %vm490_vm5, %v974_v41, %v976_v60 }
 0x35d   : > { %v966_v61 = vpop.permute.xlu0 %965  ;;  %v988_v59 = vpop.permute.xlu1 %987 }
 0x35e   : > { %v997_v62 = vsel %vm490_vm5, %v964_v21, %v966_v61  ;;  %v998_v63 = vsel %vm490_vm5, %v966_v61, %v968_v57 }
 0x35f   : > { %1031 = vmatprep.subr.bf16.mxu1 %v998_v63 }
 0x360   : > { %1032 = vmatpush1.bf16.msra.mxu1 %v997_v62 }
 0x361   : > { %v978_v0 = vpop.permute.xlu0 %977  ;;  %v970_v1 = vpop.permute.xlu1 %969 }
 0x362   : > { %v1002_v2 = vsel %vm490_vm5, %v976_v60, %v978_v0  ;;  %v999_v31 = vsel %vm490_vm5, %v968_v57, %v970_v1 }
 0x363   : > { %1033 = vmatprep.subr.bf16.mxu1 %v1002_v2 }
 0x364   : > { %1034 = vmatpush1.bf16.msra.mxu1 %v1001_v3 }
 0x365   : > { %v986_v4 = vpop.permute.xlu0 %985  ;;  %v980_v5 = vpop.permute.xlu1 %979 }
 0x366   : > { %v1005_v6 = vsel %vm490_vm5, %v984_v20, %v986_v4  ;;  %v1006_v7 = vsel %vm490_vm5, %v986_v4, %v988_v59  ;;  %v1004_v33 = vsel %vm490_vm5, %v980_v5, %v982_v54  ;;  %v1003_v37 = vsel %vm490_vm5, %v978_v0, %v980_v5 }
 0x367   : > { %1035 = vmatprep.subr.bf16.mxu1 %v1006_v7 }
 0x368   : > { %1036 = vmatpush1.bf16.msra.mxu1 %v1005_v6 }
 0x369   : > { %v1157_v9 = vpop.permute.xlu0 %1156  ;;  %1070 = vmatprep.subr.bf16.mxu1 %v2379_v14  ;;  %v990_v10 = vpop.permute.xlu1 %989 }
 0x36a   : > { %v1008_v38 = vsel %vm490_vm5, %v990_v10, %v992_v56  ;;  %v1007_v46 = vsel %vm490_vm5, %v988_v59, %v990_v10  ;;  %v1188_v20 = vsel %vm505_vm6, %v2476_v40, %v1157_v9 }
 0x36b   : > { %1820 = vmatmul.mubr.msk.bf16.vlgmr.msra.gmra.mrb[4].mxu1 %vm1025_vm0, %v902_v8 }
 0x36c   : > { %1071 = vmatpush1.bf16.msra.mxu1 %v2347_v15  ;;  %1102 = vmatprep.mubr.bf16.mxu1 %v1944_v17 }
 0x36d   : > { %v1161_v11 = vpop.permute.xlu0 %1160  ;;  %v1159_v13 = vpop.permute.xlu1 %1158 }
 0x36e   : > { %v1189_v49 = vsel %vm505_vm6, %v1157_v9, %v1159_v13  ;;  %v1190_v54 = vsel %vm505_vm6, %v1159_v13, %v1161_v11  ;;  %v1831_v13 = vld [vmem:[%s2698_s4 + $0x8] sm:$0xf] }
 0x371   : > { %v1169_v16 = vpop.permute.xlu0 %1168  ;;  %v1167_v18 = vpop.permute.xlu1 %1166 }
 0x372   : > { %v1192_v56 = vsel %vm505_vm6, %v2488_v51, %v1167_v18 }
 0x375   : > { %v1177_v19 = vpop.permute.xlu0 %1176  ;;  %v1171_v22 = vpop.permute.xlu1 %1170 }
 0x376   : > { %v1195_v40 = vsel %vm505_vm6, %v1171_v22, %v2500_v58  ;;  %v1196_v59 = vsel %vm505_vm6, %v2481_v42, %v1177_v19  ;;  %v1194_v62 = vsel %vm505_vm6, %v1169_v16, %v1171_v22  ;;  %v1824_v58 = vld [vmem:[%s2698_s4 + $0x4] sm:$0xf] }
 0x379   : > { %v2515_v25 = vpop.permute.xlu0 %1180  ;;  %v1179_v26 = vpop.permute.xlu1 %1178 }
 0x37a   : > { %v1197_v57 = vsel %vm505_vm6, %v1177_v19, %v1179_v26  ;;  %v1199_v51 = vsel %vm505_vm6, %v2515_v25, %v2498_v55  ;;  %v1198_v42 = vsel %vm505_vm6, %v1179_v26, %v2515_v25 }
 0x37d   : > { %v2517_v27 = vpop.permute.xlu0 %1350  ;;  %v2519_v28 = vpop.permute.xlu1 %1352 }
 0x37e   : > { %v1384_v55 = vsel %vm1378_vm15, %v2517_v27, %v2519_v28 }
 0x381   : > { %v2521_v14 = vpop.permute.xlu0 %1354  ;;  %v2523_v29 = vpop.permute.xlu1 %1360 }
 0x385   : > { %v972_v15 = vpop.permute.xlu0 %971  ;;  %v2525_v12 = vpop.permute.xlu1 %1364 }
 0x386   : > { %v1000_v30 = vsel %vm490_vm5, %v970_v1, %v972_v15 }
 0x387   : > { %1072 = vmatprep.subr.bf16.mxu1 %v1000_v30 }
 0x388   : > { %1073 = vmatpush1.bf16.msra.mxu1 %v999_v31 }
 0x389   : > { %v2530_v35 = vpop.permute.xlu0 %1362  ;;  %1074 = vmatprep.subr.bf16.mxu1 %v1004_v33  ;;  %v2532_v36 = vpop.permute.xlu1 %1358 }
 0x38a   : > { %v1389_v9 = vsel %vm1378_vm15, %v2530_v35, %v2525_v12 }
 0x38c   : > { %1075 = vmatpush1.bf16.msra.mxu1 %v1003_v37 }
 0x38d   : > { %v2536_v39 = vpop.permute.xlu0 %1370  ;;  %1076 = vmatprep.subr.bf16.mxu1 %v1008_v38  ;;  %v2538_v45 = vpop.permute.xlu1 %1372 }
 0x38e   : > { %v1392_v5 = vsel %vm1378_vm15, %v2536_v39, %v2538_v45 }
 0x390   : > { %1077 = vmatpush1.bf16.msra.mxu1 %v1007_v46 }
 0x391   : > { %v2541_v47 = vpop.permute.xlu0 %1374  ;;  %1219 = vmatprep.subr.bf16.mxu1 %v2364_v24  ;;  %v2544_v48 = vpop.permute.xlu1 %1529  ;;  %v1193_v24 = vsel %vm505_vm6, %v1167_v18, %v1169_v16 }
 0x392   : > { %v1393_v22 = vsel %vm1378_vm15, %v2538_v45, %v2541_v47 }
 0x393   : > { %1821 = vmatmul.mubr.msk.bf16.vlgmr.msra.gmra.mrb[8].mxu1 %vm1025_vm0, %v902_v8 }
 0x394   : > { %1220 = vmatpush1.bf16.msra.mxu1 %v2358_v23  ;;  %1251 = vmatprep.mubr.bf16.mxu1 %v1944_v17 }
 0x395   : > { %v2550_v50 = vpop.permute.xlu0 %1368  ;;  %1221 = vmatprep.subr.bf16.mxu1 %v1189_v49  ;;  %v2552_v21 = vpop.permute.xlu1 %1533 }
 0x396   : > { %v1391_v10 = vsel %vm1378_vm15, %v2550_v50, %v2536_v39 }
 0x398   : > { %1222 = vmatpush1.bf16.msra.mxu1 %v1188_v20 }
 0x399   : > { %v2557_v41 = vpop.permute.xlu0 %1531  ;;  %1223 = vmatprep.subr.bf16.mxu1 %v1193_v24  ;;  %v1163_v53 = vpop.permute.xlu1 %1162 }
 0x39a   : > { %v1191_v23 = vsel %vm505_vm6, %v1161_v11, %v1163_v53  ;;  %v1569_v11 = vsel %vm1567_vm1, %v2544_v48, %v2557_v41 }
 0x39b   : > { %1262 = vmatprep.subr.bf16.mxu0 %v1191_v23 }
 0x39c   : > { %1224 = vmatpush1.bf16.msra.mxu1 %v1192_v56  ;;  %1263 = vmatpush1.bf16.msra.mxu0 %v1190_v54 }
 0x39d   : > { %v2566_v60 = vpop.permute.xlu0 %1535  ;;  %1225 = vmatprep.subr.bf16.mxu1 %v1197_v57  ;;  %1264 = vmatprep.subr.bf16.mxu0 %v1195_v40  ;;  %v1528_v61 = vpop.permute.xlu1 %1527 }
 0x39e   : > { %v1568_v25 = vsel %vm1567_vm1, %v1528_v61, %v2544_v48 }
 0x3a0   : > { %1226 = vmatpush1.bf16.msra.mxu1 %v1196_v59  ;;  %1265 = vmatpush1.bf16.msra.mxu0 %v1194_v62 }
 0x3a1   : > { %v1540_v63 = vpop.permute.xlu0 %1539  ;;  %1266 = vmatprep.subr.bf16.mxu0 %v1199_v51  ;;  %1414 = vmatprep.subr.bf16.mxu1 %v2395_v34  ;;  %v2578_v0 = vpop.permute.xlu1 %1541  ;;  %v1383_v34 = vsel %vm1378_vm15, %v2490_v52, %v2517_v27  ;;  %v1385_v52 = vsel %vm1378_vm15, %v2519_v28, %v2521_v14  ;;  %v1571_v27 = vsel %vm1567_vm1, %v2552_v21, %v2566_v60 }
 0x3a2   : > { %v1573_v26 = vsel %vm1567_vm1, %v1540_v63, %v2578_v0 }
 0x3a3   : > { %1825 = vmatmul.mubr.msk.bf16.vlgmr.msra.gmra.mrb[12].mxu1 %vm1025_vm0, %v1824_v58 }
 0x3a4   : > { %1267 = vmatpush1.bf16.msra.mxu0 %v1198_v42  ;;  %1415 = vmatpush1.bf16.msra.mxu1 %v2388_v32  ;;  %v1388_v32 = vsel %vm1378_vm15, %v2523_v29, %v2530_v35 }
 0x3a5   : > { %v1544_v1 = vpop.permute.xlu0 %1543  ;;  %1416 = vmatprep.subr.bf16.mxu1 %v1384_v55  ;;  %1455 = vmatprep.subr.bf16.mxu0 %v2408_v44  ;;  %v1357_v2 = vpop.permute.xlu1 %1356 }
 0x3a6   : > { %1446 = vmatprep.mubr.bf16.mxu1 %v1944_v17  ;;  %v1386_v3 = vsel %vm1378_vm15, %v2521_v14, %v1357_v2  ;;  %v1574_v35 = vsel %vm1567_vm1, %v2578_v0, %v1544_v1 }
 0x3a7   : > { %1826 = vmatmul.mubr.msk.bf16.vlgmr.msra.gmra.mrb[8].mxu0 %vm1025_vm0, %v1824_v58 }
 0x3a8   : > { %1417 = vmatpush1.bf16.msra.mxu1 %v1383_v34  ;;  %1456 = vmatpush1.bf16.msra.mxu0 %v2403_v43  ;;  %v1387_v43 = vsel %vm1378_vm15, %v2532_v36, %v2523_v29  ;;  %v1570_v29 = vsel %vm1567_vm1, %v2557_v41, %v2552_v21  ;;  %v1838_v21 = vld [vmem:[%s2698_s4 + $0xc] sm:$0xf] }
 0x3a9   : > { %v1367_v44 = vpop.permute.xlu0 %1366  ;;  %1418 = vmatprep.subr.bf16.mxu1 %v1388_v32  ;;  %1457 = vmatprep.subr.bf16.mxu0 %v1386_v3  ;;  %v1550_v4 = vpop.permute.xlu1 %1549 }
 0x3aa   : > { %1487 = vmatprep.mubr.bf16.mxu0 %v1944_v17  ;;  %v1390_v6 = vsel %vm1378_vm15, %v2525_v12, %v1367_v44 }
 0x3ac   : > { %1419 = vmatpush1.bf16.msra.mxu1 %v1387_v43  ;;  %1458 = vmatpush1.bf16.msra.mxu0 %v1385_v52 }
 0x3ad   : > { %v1538_v7 = vpop.permute.xlu0 %1537  ;;  %1420 = vmatprep.subr.bf16.mxu1 %v1392_v5  ;;  %1459 = vmatprep.subr.bf16.mxu0 %v1390_v6  ;;  %v1554_v8 = vpop.permute.xlu1 %1553 }
 0x3ae   : > { %v1572_v15 = vsel %vm1567_vm1, %v1538_v7, %v1540_v63 }
 0x3b0   : > { %1421 = vmatpush1.bf16.msra.mxu1 %v1391_v10  ;;  %1460 = vmatpush1.bf16.msra.mxu0 %v1389_v9 }
 0x3b1   : > { %v1552_v16 = vpop.permute.xlu0 %1551  ;;  %1603 = vmatprep.subr.bf16.mxu1 %v1569_v11  ;;  %v1377_v18 = vpop.permute.xlu1 %1376 }
 0x3b2   : > { %v1394_v19 = vsel %vm1378_vm15, %v2541_v47, %v1377_v18  ;;  %v1577_v12 = vsel %vm1567_vm1, %v1550_v4, %v1552_v16  ;;  %v1578_v46 = vsel %vm1567_vm1, %v1552_v16, %v1554_v8 }
 0x3b3   : > { %1832 = vmatmul.mubr.msk.bf16.vlgmr.msra.gmra.mrb[16].mxu1 %vm1025_vm0, %v1831_v13  ;;  %1461 = vmatprep.subr.bf16.mxu0 %v1394_v19 }
 0x3b4   : > { %1462 = vmatpush1.bf16.msra.mxu0 %v1393_v22  ;;  %1604 = vmatpush1.bf16.msra.mxu1 %v1568_v25 }
 0x3b5   : > { %v1560_v28 = vpop.permute.xlu0 %1559  ;;  %1605 = vmatprep.subr.bf16.mxu1 %v1573_v26  ;;  %1644 = vmatprep.subr.bf16.mxu0 %v1571_v27  ;;  %v1548_v14 = vpop.permute.xlu1 %1547 }
 0x3b6   : > { %1635 = vmatprep.mubr.bf16.mxu1 %v1944_v17  ;;  %v1576_v36 = vsel %vm1567_vm1, %v1548_v14, %v1550_v4 }
 0x3b7   : > { %1833 = vmatmul.mubr.msk.bf16.vlgmr.msra.gmra.mrb[12].mxu0 %vm1025_vm0, %v1831_v13 }
 0x3b8   : > { %1606 = vmatpush1.bf16.msra.mxu1 %v1572_v15  ;;  %1645 = vmatpush1.bf16.msra.mxu0 %v1570_v29 }
 0x3b9   : > { %v1556_v30 = vpop.permute.xlu0 %1555  ;;  %1607 = vmatprep.subr.bf16.mxu1 %v1577_v12  ;;  %v1546_v31 = vpop.permute.xlu1 %1545  ;;  %1676 = vmatprep.mubr.bf16.mxu0 %v1944_v17 }
 0x3ba   : > { %v1575_v33 = vsel %vm1567_vm1, %v1544_v1, %v1546_v31  ;;  %v1579_v37 = vsel %vm1567_vm1, %v1554_v8, %v1556_v30 }
 0x3bb   : > { %1646 = vmatprep.subr.bf16.mxu0 %v1575_v33 }
 0x3bc   : > { %1608 = vmatpush1.bf16.msra.mxu1 %v1576_v36  ;;  %1647 = vmatpush1.bf16.msra.mxu0 %v1574_v35 }
 0x3bd   : > { %v1564_v38 = vpop.permute.xlu0 %1563  ;;  %1648 = vmatprep.subr.bf16.mxu0 %v1579_v37  ;;  %v1562_v39 = vpop.permute.xlu1 %1561 }
 0x3be   : > { %v1581_v45 = vsel %vm1567_vm1, %v1560_v28, %v1562_v39  ;;  %v1582_v50 = vsel %vm1567_vm1, %v1562_v39, %v1564_v38 }
 0x3bf   : > { %1609 = vmatprep.subr.bf16.mxu1 %v1581_v45 }
 0x3c0   : > { %1649 = vmatpush1.bf16.msra.mxu0 %v1578_v46 }
 0x3c1   : > { %v1558_v17 = vpop.permute.xlu0 %1557  ;;  %v1566_v47 = vpop.permute.xlu1 %1565 }
 0x3c2   : > { %v1580_v48 = vsel %vm1567_vm1, %v1558_v17, %v1560_v28  ;;  %v1583_v49 = vsel %vm1567_vm1, %v1564_v38, %v1566_v47 }
 0x3c3   : > { %1610 = vmatpush1.bf16.msra.mxu1 %v1580_v48  ;;  %1650 = vmatprep.subr.bf16.mxu0 %v1583_v49 }
 0x3c4   : > { %1651 = vmatpush1.bf16.msra.mxu0 %v1582_v50 }
 0x3c6   : > { %1839 = vmatmul.mubr.msk.bf16.vlgmr.msra.gmra.mrb[20].mxu1 %vm1025_vm0, %v1838_v21 }
 0x3c7   : > { %1840 = vmatmul.mubr.msk.bf16.vlgmr.msra.gmra.mrb[16].mxu0 %vm1025_vm0, %v1838_v21 }
 0x3d2   : > { %v951_v20 = vpop.permute.xlu1 %950  ;;  %v1142_v2 = vpop.permute.xlu0 %1141 }
 0x3d6   : > { %v1336_v22 = vpop.permute.xlu1 %1335  ;;  %v1525_v17 = vpop.permute.xlu0 %1524 }
 0x43e   : > { %v1063_v24 = vpop.f32.mrb[4].mxu1 }
 0x43f   : > { %v1064_v41 = vadd.f32 %v1063_v24, %v951_v20  ;;  %v1065_v53 = vpop.f32.mrb[5].mxu1 }
 0x440   : > { %v1066_v23 = vadd.f32 %v1065_v53, %v951_v20  ;;  %v1067_v54 = vpop.f32.mrb[6].mxu1 }
 0x441   : > { %v1111_v56 = vmax.f32 %v1064_v41, 0.0  ;;  %v1068_v57 = vpop.f32.mrb[7].mxu1 }
 0x442   : > { %v1112_v40 = vmax.f32 %v1066_v23, 0.0 }
 0x444   : > { %v1848_v60 = vpack.c.bf16 %v1112_v40, %v1111_v56 }
 0x446   : > { %1131 = vst [vmem:[%s2663_s26] sm:$0xff] %v1848_v60 }
 0x466   : > { %v1104_v61 = vpop.f32.mrb[8].mxu1 }
 0x467   : > { %v1105_v59 = vadd.f32 %v1104_v61, %v951_v20  ;;  %v1106_v62 = vpop.f32.mrb[9].mxu1 }
 0x468   : > { %v1107_v51 = vadd.f32 %v1106_v62, %v951_v20  ;;  %v1108_v58 = vpop.f32.mrb[10].mxu1 }
 0x469   : > { %v1113_v63 = vmax.f32 %v1105_v59, 0.0  ;;  %v1109_v0 = vpop.f32.mrb[11].mxu1 }
 0x46a   : > { %v1114_v42 = vmax.f32 %v1107_v51, 0.0 }
 0x46c   : > { %v1849_v1 = vpack.c.bf16 %v1114_v42, %v1113_v63 }
 0x46e   : > { %1135 = vst.msk [vmem:[%s2663_s26 + $0x8] sm:$0xff] %vm2666_vm4, %v1849_v1 }
 0x476   : > { %v1253_v34 = vpop.f32.mrb[12].mxu1 }
 0x477   : > { %v1254_v32 = vadd.f32 %v1253_v34, %v1142_v2  ;;  %v1255_v3 = vpop.f32.mrb[13].mxu1 }
 0x478   : > { %v1256_v44 = vadd.f32 %v1255_v3, %v1142_v2  ;;  %v1257_v4 = vpop.f32.mrb[14].mxu1 }
 0x479   : > { %v1301_v52 = vmax.f32 %v1254_v32, 0.0  ;;  %v1258_v43 = vpop.f32.mrb[15].mxu1 }
 0x47a   : > { %v1302_v5 = vmax.f32 %v1256_v44, 0.0  ;;  %v1294_v6 = vpop.f32.mrb[8].mxu0 }
 0x47b   : > { %v1295_v7 = vadd.f32 %v1294_v6, %v1142_v2  ;;  %v1296_v8 = vpop.f32.mrb[9].mxu0 }
 0x47c   : > { %v1850_v9 = vpack.c.bf16 %v1302_v5, %v1301_v52  ;;  %v1297_v10 = vadd.f32 %v1296_v8, %v1142_v2  ;;  %v1298_v11 = vpop.f32.mrb[10].mxu0 }
 0x47d   : > { %v1303_v13 = vmax.f32 %v1295_v7, 0.0  ;;  %v1299_v16 = vpop.f32.mrb[11].mxu0 }
 0x47e   : > { %1829 = vst [vmem:[%s2663_s26 + $0x10] sm:$0xff] %v1850_v9  ;;  %v1304_v18 = vmax.f32 %v1297_v10, 0.0 }
 0x480   : > { %v1851_v19 = vpack.c.bf16 %v1304_v18, %v1303_v13 }
 0x482   : > { %1830 = vst.msk [vmem:[%s2663_s26 + $0x18] sm:$0xff] %vm2666_vm4, %v1851_v19 }
 0x486   : > { %v1448_v25 = vpop.f32.mrb[16].mxu1 }
 0x487   : > { %v1449_v26 = vadd.f32 %v1448_v25, %v1336_v22  ;;  %v1450_v27 = vpop.f32.mrb[17].mxu1 }
 0x488   : > { %v1451_v28 = vadd.f32 %v1450_v27, %v1336_v22  ;;  %v1452_v14 = vpop.f32.mrb[18].mxu1 }
 0x489   : > { %v1496_v29 = vmax.f32 %v1449_v26, 0.0  ;;  %v1453_v15 = vpop.f32.mrb[19].mxu1 }
 0x48a   : > { %v1497_v12 = vmax.f32 %v1451_v28, 0.0  ;;  %v1489_v30 = vpop.f32.mrb[12].mxu0 }
 0x48b   : > { %v1490_v31 = vadd.f32 %v1489_v30, %v1336_v22  ;;  %v1491_v33 = vpop.f32.mrb[13].mxu0 }
 0x48c   : > { %v1852_v35 = vpack.c.bf16 %v1497_v12, %v1496_v29  ;;  %v1492_v36 = vadd.f32 %v1491_v33, %v1336_v22  ;;  %v1493_v37 = vpop.f32.mrb[14].mxu0 }
 0x48d   : > { %v1498_v38 = vmax.f32 %v1490_v31, 0.0  ;;  %v1494_v39 = vpop.f32.mrb[15].mxu0 }
 0x48e   : > { %1836 = vst [vmem:[%s2663_s26 + $0x20] sm:$0xff] %v1852_v35  ;;  %v1499_v45 = vmax.f32 %v1492_v36, 0.0 }
 0x490   : > { %v1853_v46 = vpack.c.bf16 %v1499_v45, %v1498_v38 }
 0x492   : > { %1837 = vst.msk [vmem:[%s2663_s26 + $0x28] sm:$0xff] %vm2666_vm4, %v1853_v46 }
 0x499   : > { %v1637_v47 = vpop.f32.mrb[20].mxu1 }
 0x49a   : > { %v1638_v48 = vadd.f32 %v1637_v47, %v1525_v17  ;;  %v1639_v49 = vpop.f32.mrb[21].mxu1  ;;  %v1678_v50 = vpop.f32.mrb[16].mxu0 }
 0x49b   : > { %v1640_v21 = vadd.f32 %v1639_v49, %v1525_v17  ;;  %v1679_v20 = vadd.f32 %v1678_v50, %v1525_v17  ;;  %v1641_v24 = vpop.f32.mrb[22].mxu1  ;;  %v1680_v41 = vpop.f32.mrb[17].mxu0 }
 0x49c   : > { %v1685_v53 = vmax.f32 %v1638_v48, 0.0  ;;  %v1681_v23 = vadd.f32 %v1680_v41, %v1525_v17  ;;  %v1642_v54 = vpop.f32.mrb[23].mxu1  ;;  %v1682_v56 = vpop.f32.mrb[18].mxu0 }
 0x49d   : > { %v1686_v57 = vmax.f32 %v1640_v21, 0.0  ;;  %v1687_v40 = vmax.f32 %v1679_v20, 0.0  ;;  %v1683_v60 = vpop.f32.mrb[19].mxu0 }
 0x49e   : > { %v1688_v61 = vmax.f32 %v1681_v23, 0.0 }
 0x49f   : > { %v1854_v59 = vpack.c.bf16 %v1686_v57, %v1685_v53 }
 0x4a0   : > { %v1855_v62 = vpack.c.bf16 %v1688_v61, %v1687_v40 }
 0x4a1   : > { %1843 = vst [vmem:[%s2663_s26 + $0x30] sm:$0xff] %v1854_v59 }
 0x4a2   : > { %1844 = vst.msk [vmem:[%s2663_s26 + $0x38] sm:$0xff] %vm2666_vm4, %v1855_v62 }
 0x4a3 PF: > { %s16_s23 = sadd.s32 1, %s1933_s23   ;;  %s2703_s21 = smov %s1929_s22 }
 0x4a4   : > { %p13_p5 = scmp.ge.s32.totalorder %s16_s23, 4   ;;  %s2704_s22 = smov %s2706_s24 }
 0x4a6   :  { %15 = sbr.rel (!%p13_p5) target bundleno = 2 (0x2), region = 80 }

</bundles_post_ra>
